<compile_context>
chip_gen: v7x
topology: tpu7x:2x2x1
jax: 0.10.0
libtpu: 0.0.40
codegen_flags: <defaults>
</compile_context>

<pallas_src>
import functools

import jax
import jax.numpy as jnp
import numpy as np
from jax import lax
from jax.experimental import pallas as pl
from jax.experimental.pallas import tpu as pltpu

LANE = 128


def _round_up(x, m):
    return ((x + m - 1) // m) * m


def _vmem_capacity_bytes():
    """Per-core VMEM capacity; conservative fallback (v7x per-TC size) if the
    trace-time query is unavailable."""
    try:
        return int(pltpu.get_tpu_info().vmem_capacity_bytes)
    except Exception:
        return 64 << 20


def _pick_tile_h(H, W, c_pad):
    """Largest divisor of H whose f32 activation tile fits the per-step VMEM budget.

    Rough accounting per grid step:
      2x input tile + 2x output tile (double-buffered)             ~ 4 T
      bf16 conv1 slab scratch (3 kw lane-blocks)                   ~ 1.5 T
      f32/bf16 compiler temporaries (conv1 out, rolls, acc, out)   ~ 5 T
    => ~10-11x the x-tile, so target x-tile ~ 0.7 * VMEM / 11
       (~4 MiB on v7x's 64 MiB, ~8 MiB on v5e/v6e's 128 MiB).
    """
    vmem = _vmem_capacity_bytes()
    budget = max(int(0.7 * vmem) // 11, 1 << 20)
    rows = max(1, budget // (W * c_pad * 4))
    rows = min(rows, H)
    while H % rows:
        rows -= 1
    return rows


def res_layer_kernel(x_ref, xtop_ref, xbot_ref,
                     w1_ref, b1_ref, w2_ref, b2_ref,
                     o_ref, slab_ref, *, negative_slope):
    """One (batch, row-tile) step of the fused ResLayer forward.

    x_ref   : (TILE_H, W, Cp)        main activation tile (f32, channel-padded)
    xtop_ref: (1, W, Cp)             row above the tile (clamped at the border)
    xbot_ref: (1, W, Cp)             row below the tile (clamped at the border)
    w1_ref  : (Cp, Chp)              1x1 conv weight, BN scale folded (bf16)
    b1_ref  : (1, Chp)               folded BN bias for conv1 (f32)
    w2_ref  : (3, 3*Chp, Cp)         3x3 conv weight, kh-major; K axis is the
                                     [kw=0 | kw=1 | kw=2] lane blocks (bf16)
    b2_ref  : (1, Cp)                folded BN bias for conv2 (f32)
    o_ref   : (TILE_H, W, Cp)        output tile (f32)
    slab_ref: ((TILE_H+2)*W, 3*Chp)  bf16 conv1 slab scratch (kw-shifted blocks)
    """
    tile_h, W, Cin = x_ref.shape
    Chid = w1_ref.shape[1]
    M = tile_h * W
    n_rows = M + 2 * W

    t = pl.program_id(1)
    n_t = pl.num_programs(1)

    w1 = w1_ref[...]                      # bf16 (Cp, Chp), BN scale pre-folded
    b1 = b1_ref[...]

    def conv1_bn_act(x2d):
        # 1x1 conv == channel matmul on the MXU (bf16 in, f32 accumulate),
        # folded-BN bias add, LeakyReLU(0.1) as mul+max.
        y = jnp.dot(x2d.astype(jnp.bfloat16), w1,
                    preferred_element_type=jnp.float32)
        y = y + b1
        return jnp.maximum(y, negative_slope * y)          # f32

    def store_shifted(y, row0):
        # y: (rows, Chid) f32 conv1 output for `rows` consecutive image rows,
        # flattened row-major over (h, w). Writes the three kw lane-blocks:
        #   block 0 -> conv1[.., w-1], block 1 -> unshifted, block 2 -> w+1.
        # The flattened +/-1 roll only wraps into positions that sit on the
        # image's left/right border column, which the mask zeroes anyway.
        rows = y.shape[0]
        col = lax.broadcasted_iota(jnp.int32, (rows, 1), 0) % W
        left = pltpu.roll(y, shift=1, axis=0)
        left = jnp.where(col == 0, 0.0, left)
        right = pltpu.roll(y, shift=rows - 1, axis=0)       # shift by -1
        right = jnp.where(col == W - 1, 0.0, right)
        slab_ref[row0:row0 + rows, 0:Chid] = left.astype(jnp.bfloat16)
        slab_ref[row0:row0 + rows, Chid:2 * Chid] = y.astype(jnp.bfloat16)
        slab_ref[row0:row0 + rows, 2 * Chid:3 * Chid] = right.astype(jnp.bfloat16)

    # Halo rows: conv2's 'SAME' padding zero-pads conv1's output, so rows
    # outside the image contribute zeros.
    y_top = conv1_bn_act(xtop_ref[...].reshape(W, Cin))
    y_top = jnp.where(t == 0, 0.0, y_top)
    store_shifted(y_top, 0)

    y_bot = conv1_bn_act(xbot_ref[...].reshape(W, Cin))
    y_bot = jnp.where(t == n_t - 1, 0.0, y_bot)
    store_shifted(y_bot, W + M)

    store_shifted(conv1_bn_act(x_ref[...].reshape(M, Cin)), W)

    # 3x3 conv as 3 matmuls with K = 3*Chid (kw folded into the lane axis),
    # value-chained accumulation, single store.
    acc = jnp.dot(slab_ref[0:M, :], w2_ref[0],
                  preferred_element_type=jnp.float32)
    acc = acc + jnp.dot(slab_ref[W:W + M, :], w2_ref[1],
                        preferred_element_type=jnp.float32)
    acc = acc + jnp.dot(slab_ref[2 * W:2 * W + M, :], w2_ref[2],
                        preferred_element_type=jnp.float32)

    y2 = acc + b2_ref[...]
    y2 = jnp.maximum(y2, negative_slope * y2)
    out = y2 + x_ref[...].reshape(M, Cin)                   # residual add, f32
    o_ref[...] = out.reshape(o_ref.shape).astype(o_ref.dtype)


def res_layer_forward(x_nchw, params, *, tile_h=None, negative_slope=0.1):
    """Wrapper: accepts NCHW (PyTorch convention), runs the tiled NHWC Pallas kernel."""
    w1, s1, b1, w2, s2, b2 = params
    N, Cin, H, W = x_nchw.shape
    Chid = w1.shape[1]
    Cout = w2.shape[3]
    assert Cin == Cout, "ResLayer residual requires in_channels == out_channels"
    # Sublane-aligned kh/kw taps; W % 16 == 0 additionally keeps the bf16 slab
    # slices tile-aligned.  TODO(synk): pad W for arbitrary widths.
    assert W % 8 == 0, "kernel requires W to be a multiple of 8"

    Cin_p = _round_up(Cin, LANE)
    Chid_p = _round_up(Chid, LANE)
    Cout_p = _round_up(Cout, LANE)

    # NCHW -> NHWC, channels zero-padded to a lane-dense multiple of 128.
    x = jnp.transpose(x_nchw, (0, 2, 3, 1))
    x = jnp.pad(x, ((0, 0), (0, 0), (0, 0), (0, Cin_p - Cin)))

    # Fold eval-mode BN scales into the conv weights (in f32, before the bf16
    # cast); only the bias adds stay in the kernel.
    w1_f = w1 * s1                                   # (Cin, Chid) * (1, Chid)
    w2_f = w2 * s2.reshape(1, 1, 1, Cout)            # (3,3,Chid,Cout)

    w1_p = jnp.pad(w1_f, ((0, Cin_p - Cin), (0, Chid_p - Chid))).astype(jnp.bfloat16)
    b1_p = jnp.pad(b1, ((0, 0), (0, Chid_p - Chid)))
    w2_p = jnp.pad(w2_f, ((0, 0), (0, 0),
                          (0, Chid_p - Chid), (0, Cout_p - Cout)))
    # (3, 3, Chid_p, Cout_p) -> (3, 3*Chid_p, Cout_p): kh-major stack whose K
    # axis is the [kw=0 | kw=1 | kw=2] lane blocks, matching the slab layout.
    w2_p = w2_p.reshape(3, 3 * Chid_p, Cout_p).astype(jnp.bfloat16)
    b2_p = jnp.pad(b2, ((0, 0), (0, Cout_p - Cout)))

    if tile_h is None:
        tile_h = _pick_tile_h(H, W, Cin_p)
    assert H % tile_h == 0, "tile_h must divide H"
    n_t = H // tile_h

    def x_main_map(n, t):
        return (n, t, 0, 0)

    def x_top_map(n, t):
        return (n, jnp.maximum(t * tile_h - 1, 0), 0, 0)

    def x_bot_map(n, t):
        return (n, jnp.minimum((t + 1) * tile_h, H - 1), 0, 0)

    full2 = lambda n, t: (0, 0)
    full3 = lambda n, t: (0, 0, 0)

    kernel = functools.partial(res_layer_kernel, negative_slope=negative_slope)

    # Scoped-VMEM limit: resident buffers + temporaries headroom, capped to the
    # physical capacity of this generation.
    tile_bytes = tile_h * W * Cin_p * 4
    slab_bytes = (tile_h + 2) * W * 3 * Chid_p * 2
    w_bytes = 2 * (w1_p.size * 2 + w2_p.size * 2 + b1_p.size * 4 + b2_p.size * 4)
    need = 4 * tile_bytes + slab_bytes + w_bytes + 6 * tile_bytes
    vmem_cap = _vmem_capacity_bytes()
    vmem_limit = int(min(0.9 * vmem_cap, max(need, 32 << 20)))

    out = pl.pallas_call(
        kernel,
        out_shape=jax.ShapeDtypeStruct((N, H, W, Cout_p), jnp.float32),
        grid=(N, n_t),
        in_specs=[
            pl.BlockSpec((None, tile_h, W, Cin_p), x_main_map),
            pl.BlockSpec((None, 1, W, Cin_p), x_top_map),
            pl.BlockSpec((None, 1, W, Cin_p), x_bot_map),
            pl.BlockSpec((Cin_p, Chid_p), full2),
            pl.BlockSpec((1, Chid_p), full2),
            pl.BlockSpec((3, 3 * Chid_p, Cout_p), full3),
            pl.BlockSpec((1, Cout_p), full2),
        ],
        out_specs=pl.BlockSpec((None, tile_h, W, Cout_p), x_main_map),
        scratch_shapes=[pltpu.VMEM(((tile_h + 2) * W, 3 * Chid_p), jnp.bfloat16)],
        compiler_params=pltpu.CompilerParams(
            dimension_semantics=("parallel", "parallel"),
            vmem_limit_bytes=vmem_limit),
    )(x, x, x, w1_p, b1_p, w2_p, b2_p)

    out = out[..., :Cout]
    return jnp.transpose(out, (0, 3, 1, 2))                 # NHWC -> NCHW


def init_params(key, in_channels):
    """Deterministic synthetic parameters matching ResLayer's shapes.

    layer1.conv.weight: (mid, Cin, 1, 1) -> stored as (Cin, mid)
    layer2.conv.weight: (Cin, mid, 3, 3) -> stored as (3, 3, mid, Cin)  [HWIO]
    BatchNorm (gamma, beta, running_mean, running_var) folded into scale/bias.
    """
    mid = in_channels // 2
    k = jax.random.split(key, 4)
    w1 = 0.1 * jax.random.normal(k[0], (in_channels, mid), jnp.float32)
    w2 = 0.1 * jax.random.normal(k[1], (3, 3, mid, in_channels), jnp.float32)

    def make_bn(kk, c, eps=1e-5):
        k1, k2, k3, k4 = jax.random.split(kk, 4)
        gamma = 1.0 + 0.1 * jax.random.normal(k1, (c,), jnp.float32)
        beta = 0.1 * jax.random.normal(k2, (c,), jnp.float32)
        mean = 0.1 * jax.random.normal(k3, (c,), jnp.float32)
        var = jnp.abs(jax.random.normal(k4, (c,), jnp.float32)) + 0.5
        scale = gamma / jnp.sqrt(var + eps)
        bias = beta - mean * scale
        return scale.reshape(1, c), bias.reshape(1, c)

    s1, b1 = make_bn(k[2], mid)
    s2, b2 = make_bn(k[3], in_channels)
    return (w1, s1, b1, w2, s2, b2)


def ref_res_layer(x_nchw, params, negative_slope=0.1):
    """Pure-JAX reference (lax.conv) with the same folded-BN bf16/f32 precision."""
    w1, s1, b1, w2, s2, b2 = params
    Cin, Chid = w1.shape
    x = jnp.transpose(x_nchw, (0, 2, 3, 1))
    dn = ('NHWC', 'HWIO', 'NHWC')
    w1_f = (w1 * s1).astype(jnp.bfloat16)
    w2_f = (w2 * s2.reshape(1, 1, 1, -1)).astype(jnp.bfloat16)

    def lrelu(v):
        return jnp.maximum(v, negative_slope * v)

    y = lax.conv_general_dilated(
        x.astype(jnp.bfloat16), w1_f.reshape(1, 1, Cin, Chid),
        (1, 1), 'SAME', dimension_numbers=dn,
        preferred_element_type=jnp.float32)
    y = lrelu(y + b1)
    y = lax.conv_general_dilated(
        y.astype(jnp.bfloat16), w2_f,
        (1, 1), 'SAME', dimension_numbers=dn,
        preferred_element_type=jnp.float32)
    y = lrelu(y + b2)
    y = y + x
    return jnp.transpose(y, (0, 3, 1, 2))


if __name__ == "__main__":
    key = jax.random.PRNGKey(0)
    kx, kp = jax.random.split(key)

    # Case 1: ResLayer(4) at (2,4,16,16); forced tile_h=8 so the grid has both
    # border and interior row halos.
    N, C, H, W = 2, 4, 16, 16
    x = jax.random.normal(kx, (N, C, H, W), jnp.float32)
    params = init_params(kp, in_channels=C)

    out = jax.block_until_ready(res_layer_forward(x, params, tile_h=8))
    ref = ref_res_layer(x, params)
    assert out.shape == (N, C, H, W)
    np.testing.assert_allclose(np.asarray(out), np.asarray(ref),
                               rtol=1e-3, atol=1e-3)

    # Case 1b: same inputs with the VMEM-budget-driven auto tile (single tile).
    out_auto = jax.block_until_ready(res_layer_forward(x, params))
    np.testing.assert_allclose(np.asarray(out_auto), np.asarray(ref),
                               rtol=1e-3, atol=1e-3)

    # Case 2: C > 128 (multi-lane-block channel matmuls) and non-square W.
    kx2, kp2 = jax.random.split(jax.random.PRNGKey(1))
    N2, C2, H2, W2 = 1, 256, 16, 32
    x2 = jax.random.normal(kx2, (N2, C2, H2, W2), jnp.float32)
    params2 = init_params(kp2, in_channels=C2)
    out2 = jax.block_until_ready(res_layer_forward(x2, params2, tile_h=8))
    ref2 = ref_res_layer(x2, params2)
    np.testing.assert_allclose(np.asarray(out2), np.asarray(ref2),
                               rtol=2e-3, atol=2e-3)

    print("KERNEL_OK")
</pallas_src>

<mosaic_0001>
module attributes {stable_mosaic.version = 11 : i64} {
  func.func @res_layer_kernel(%arg0: i32, %arg1: i32, %arg2: memref<1x8x16x128xf32, #tpu.memory_space<vmem>>, %arg3: memref<1x1x16x128xf32, #tpu.memory_space<vmem>>, %arg4: memref<1x1x16x128xf32, #tpu.memory_space<vmem>>, %arg5: memref<128x128xbf16, #tpu.memory_space<vmem>>, %arg6: memref<1x128xf32, #tpu.memory_space<vmem>>, %arg7: memref<3x384x128xbf16, #tpu.memory_space<vmem>>, %arg8: memref<1x128xf32, #tpu.memory_space<vmem>>, %arg9: memref<1x8x16x128xf32, #tpu.memory_space<vmem>>, %arg10: memref<160x384xbf16, #tpu.memory_space<vmem>>) attributes {dimension_semantics = [#tpu.dimension_semantics<parallel>, #tpu.dimension_semantics<parallel>], iteration_bounds = array<i64: 2, 2>, scalar_prefetch = 0 : i64, scratch_operands = 1 : i64, tpu.core_type = #tpu.core_type<tc>, window_params = [{transform_indices = @transform_0, window_bounds = array<i64: 1, 8, 16, 128>}, {transform_indices = @transform_1, window_bounds = array<i64: 1, 1, 16, 128>}, {transform_indices = @transform_2, window_bounds = array<i64: 1, 1, 16, 128>}, {pipeline_mode = #tpu.pipeline_mode<synchronous>, transform_indices = @transform_3, window_bounds = array<i64: 128, 128>}, {pipeline_mode = #tpu.pipeline_mode<synchronous>, transform_indices = @transform_4, window_bounds = array<i64: 1, 128>}, {pipeline_mode = #tpu.pipeline_mode<synchronous>, transform_indices = @transform_5, window_bounds = array<i64: 3, 384, 128>}, {pipeline_mode = #tpu.pipeline_mode<synchronous>, transform_indices = @transform_6, window_bounds = array<i64: 1, 128>}, {transform_indices = @transform_7, window_bounds = array<i64: 1, 8, 16, 128>}]} {
    %c0 = arith.constant 0 : index
    %c0_0 = arith.constant 0 : index
    %0 = vector.load %arg5[%c0, %c0_0] : memref<128x128xbf16, #tpu.memory_space<vmem>>, vector<128x128xbf16>
    %c0_1 = arith.constant 0 : index
    %c0_2 = arith.constant 0 : index
    %1 = vector.load %arg6[%c0_1, %c0_2] : memref<1x128xf32, #tpu.memory_space<vmem>>, vector<1x128xf32>
    %c0_3 = arith.constant 0 : index
    %c0_4 = arith.constant 0 : index
    %c0_5 = arith.constant 0 : index
    %c0_6 = arith.constant 0 : index
    %2 = vector.load %arg3[%c0_3, %c0_4, %c0_5, %c0_6] : memref<1x1x16x128xf32, #tpu.memory_space<vmem>>, vector<1x1x16x128xf32>
    %3 = vector.shape_cast %2 : vector<1x1x16x128xf32> to vector<1x16x128xf32>
    %4 = vector.shape_cast %3 : vector<1x16x128xf32> to vector<16x128xf32>
    %5 = arith.truncf %4 : vector<16x128xf32> to vector<16x128xbf16>
    %cst = arith.constant dense<0.000000e+00> : vector<16x128xf32>
    %6 = tpu.matmul %5, %0, %cst {dimension_numbers = #tpu.dot_dimension_numbers<[1], [0], [0], [1], [0, 0, 1, 1], [], []>} : vector<16x128xbf16>, vector<128x128xbf16>, vector<16x128xf32> -> vector<16x128xf32>
    %7 = vector.broadcast %1 : vector<1x128xf32> to vector<16x128xf32>
    %8 = arith.addf %6, %7 : vector<16x128xf32>
    %cst_7 = arith.constant 1.000000e-01 : f32
    %9 = vector.broadcast %cst_7 : f32 to vector<16x128xf32>
    %10 = arith.mulf %9, %8 : vector<16x128xf32>
    %11 = arith.maximumf %8, %10 : vector<16x128xf32>
    %c0_i32 = arith.constant 0 : i32
    %12 = arith.cmpi eq, %arg1, %c0_i32 : i32
    %cst_8 = arith.constant 0.000000e+00 : f32
    %13 = vector.broadcast %cst_8 : f32 to vector<16x128xf32>
    %14 = arith.select %12, %13, %11 : vector<16x128xf32>
    %15 = tpu.iota {dimensions = array<i32: 0>} : vector<16x1xi32>
    %c16_i32 = arith.constant 16 : i32
    %c0_i32_9 = arith.constant 0 : i32
    %16 = arith.cmpi eq, %c16_i32, %c0_i32_9 : i32
    %c1_i32 = arith.constant 1 : i32
    %17 = arith.select %16, %c1_i32, %c16_i32 : i32
    %18 = vector.broadcast %17 : i32 to vector<16x1xi32>
    %19 = arith.remsi %15, %18 : vector<16x1xi32>
    %c0_i32_10 = arith.constant 0 : i32
    %20 = vector.broadcast %c0_i32_10 : i32 to vector<16x1xi32>
    %21 = arith.cmpi ne, %19, %20 : vector<16x1xi32>
    %c0_i32_11 = arith.constant 0 : i32
    %22 = vector.broadcast %c0_i32_11 : i32 to vector<16x1xi32>
    %23 = arith.cmpi slt, %19, %22 : vector<16x1xi32>
    %c0_i32_12 = arith.constant 0 : i32
    %24 = arith.cmpi slt, %17, %c0_i32_12 : i32
    %25 = vector.broadcast %24 : i1 to vector<16x1xi1>
    %26 = vector.broadcast %25 : vector<16x1xi1> to vector<16x1xi1>
    %27 = arith.xori %23, %26 : vector<16x1xi1>
    %28 = arith.andi %27, %21 : vector<16x1xi1>
    %29 = vector.broadcast %17 : i32 to vector<16x1xi32>
    %30 = arith.addi %19, %29 : vector<16x1xi32>
    %31 = arith.select %28, %30, %19 : vector<16x1xi1>, vector<16x1xi32>
    %c1_i32_13 = arith.constant 1 : i32
    %32 = tpu.dynamic_rotate %14 by %c1_i32_13 dim 0 : vector<16x128xf32>, i32 -> vector<16x128xf32>
    %c0_i32_14 = arith.constant 0 : i32
    %33 = vector.broadcast %c0_i32_14 : i32 to vector<16x1xi32>
    %34 = arith.cmpi eq, %31, %33 : vector<16x1xi32>
    %cst_15 = arith.constant 0.000000e+00 : f32
    %35 = vector.shape_cast %34 : vector<16x1xi1> to vector<16x1xi1>
    %36 = vector.broadcast %35 : vector<16x1xi1> to vector<16x128xi1>
    %37 = vector.broadcast %cst_15 : f32 to vector<16x128xf32>
    %38 = arith.select %36, %37, %32 : vector<16x128xi1>, vector<16x128xf32>
    %c15_i32 = arith.constant 15 : i32
    %39 = tpu.dynamic_rotate %14 by %c15_i32 dim 0 : vector<16x128xf32>, i32 -> vector<16x128xf32>
    %c15_i32_16 = arith.constant 15 : i32
    %40 = vector.broadcast %c15_i32_16 : i32 to vector<16x1xi32>
    %41 = arith.cmpi eq, %31, %40 : vector<16x1xi32>
    %cst_17 = arith.constant 0.000000e+00 : f32
    %42 = vector.shape_cast %41 : vector<16x1xi1> to vector<16x1xi1>
    %43 = vector.broadcast %42 : vector<16x1xi1> to vector<16x128xi1>
    %44 = vector.broadcast %cst_17 : f32 to vector<16x128xf32>
    %45 = arith.select %43, %44, %39 : vector<16x128xi1>, vector<16x128xf32>
    %46 = arith.truncf %38 : vector<16x128xf32> to vector<16x128xbf16>
    %c0_18 = arith.constant 0 : index
    %c0_19 = arith.constant 0 : index
    %47 = vector.load %arg10[%c0_18, %c0_19] : memref<160x384xbf16, #tpu.memory_space<vmem>>, vector<16x128xbf16>
    tpu.vector_store %arg10[%c0_18, %c0_19], %46 {strides = array<i32>} : memref<160x384xbf16, #tpu.memory_space<vmem>>, vector<16x128xbf16>,
    %48 = arith.truncf %14 : vector<16x128xf32> to vector<16x128xbf16>
    %c0_20 = arith.constant 0 : index
    %c128 = arith.constant 128 : index
    %49 = vector.load %arg10[%c0_20, %c128] : memref<160x384xbf16, #tpu.memory_space<vmem>>, vector<16x128xbf16>
    tpu.vector_store %arg10[%c0_20, %c128], %48 {strides = array<i32>} : memref<160x384xbf16, #tpu.memory_space<vmem>>, vector<16x128xbf16>,
    %50 = arith.truncf %45 : vector<16x128xf32> to vector<16x128xbf16>
    %c0_21 = arith.constant 0 : index
    %c256 = arith.constant 256 : index
    %51 = vector.load %arg10[%c0_21, %c256] : memref<160x384xbf16, #tpu.memory_space<vmem>>, vector<16x128xbf16>
    tpu.vector_store %arg10[%c0_21, %c256], %50 {strides = array<i32>} : memref<160x384xbf16, #tpu.memory_space<vmem>>, vector<16x128xbf16>,
    %c0_22 = arith.constant 0 : index
    %c0_23 = arith.constant 0 : index
    %c0_24 = arith.constant 0 : index
    %c0_25 = arith.constant 0 : index
    %52 = vector.load %arg4[%c0_22, %c0_23, %c0_24, %c0_25] : memref<1x1x16x128xf32, #tpu.memory_space<vmem>>, vector<1x1x16x128xf32>
    %53 = vector.shape_cast %52 : vector<1x1x16x128xf32> to vector<1x16x128xf32>
    %54 = vector.shape_cast %53 : vector<1x16x128xf32> to vector<16x128xf32>
    %55 = arith.truncf %54 : vector<16x128xf32> to vector<16x128xbf16>
    %cst_26 = arith.constant dense<0.000000e+00> : vector<16x128xf32>
    %56 = tpu.matmul %55, %0, %cst_26 {dimension_numbers = #tpu.dot_dimension_numbers<[1], [0], [0], [1], [0, 0, 1, 1], [], []>} : vector<16x128xbf16>, vector<128x128xbf16>, vector<16x128xf32> -> vector<16x128xf32>
    %57 = vector.broadcast %1 : vector<1x128xf32> to vector<16x128xf32>
    %58 = arith.addf %56, %57 : vector<16x128xf32>
    %cst_27 = arith.constant 1.000000e-01 : f32
    %59 = vector.broadcast %cst_27 : f32 to vector<16x128xf32>
    %60 = arith.mulf %59, %58 : vector<16x128xf32>
    %61 = arith.maximumf %58, %60 : vector<16x128xf32>
    %c1_i32_28 = arith.constant 1 : i32
    %62 = arith.cmpi eq, %arg1, %c1_i32_28 : i32
    %cst_29 = arith.constant 0.000000e+00 : f32
    %63 = vector.broadcast %cst_29 : f32 to vector<16x128xf32>
    %64 = arith.select %62, %63, %61 : vector<16x128xf32>
    %65 = tpu.iota {dimensions = array<i32: 0>} : vector<16x1xi32>
    %c16_i32_30 = arith.constant 16 : i32
    %c0_i32_31 = arith.constant 0 : i32
    %66 = arith.cmpi eq, %c16_i32_30, %c0_i32_31 : i32
    %c1_i32_32 = arith.constant 1 : i32
    %67 = arith.select %66, %c1_i32_32, %c16_i32_30 : i32
    %68 = vector.broadcast %67 : i32 to vector<16x1xi32>
    %69 = arith.remsi %65, %68 : vector<16x1xi32>
    %c0_i32_33 = arith.constant 0 : i32
    %70 = vector.broadcast %c0_i32_33 : i32 to vector<16x1xi32>
    %71 = arith.cmpi ne, %69, %70 : vector<16x1xi32>
    %c0_i32_34 = arith.constant 0 : i32
    %72 = vector.broadcast %c0_i32_34 : i32 to vector<16x1xi32>
    %73 = arith.cmpi slt, %69, %72 : vector<16x1xi32>
    %c0_i32_35 = arith.constant 0 : i32
    %74 = arith.cmpi slt, %67, %c0_i32_35 : i32
    %75 = vector.broadcast %74 : i1 to vector<16x1xi1>
    %76 = vector.broadcast %75 : vector<16x1xi1> to vector<16x1xi1>
    %77 = arith.xori %73, %76 : vector<16x1xi1>
    %78 = arith.andi %77, %71 : vector<16x1xi1>
    %79 = vector.broadcast %67 : i32 to vector<16x1xi32>
    %80 = arith.addi %69, %79 : vector<16x1xi32>
    %81 = arith.select %78, %80, %69 : vector<16x1xi1>, vector<16x1xi32>
    %c1_i32_36 = arith.constant 1 : i32
    %82 = tpu.dynamic_rotate %64 by %c1_i32_36 dim 0 : vector<16x128xf32>, i32 -> vector<16x128xf32>
    %c0_i32_37 = arith.constant 0 : i32
    %83 = vector.broadcast %c0_i32_37 : i32 to vector<16x1xi32>
    %84 = arith.cmpi eq, %81, %83 : vector<16x1xi32>
    %cst_38 = arith.constant 0.000000e+00 : f32
    %85 = vector.shape_cast %84 : vector<16x1xi1> to vector<16x1xi1>
    %86 = vector.broadcast %85 : vector<16x1xi1> to vector<16x128xi1>
    %87 = vector.broadcast %cst_38 : f32 to vector<16x128xf32>
    %88 = arith.select %86, %87, %82 : vector<16x128xi1>, vector<16x128xf32>
    %c15_i32_39 = arith.constant 15 : i32
    %89 = tpu.dynamic_rotate %64 by %c15_i32_39 dim 0 : vector<16x128xf32>, i32 -> vector<16x128xf32>
    %c15_i32_40 = arith.constant 15 : i32
    %90 = vector.broadcast %c15_i32_40 : i32 to vector<16x1xi32>
    %91 = arith.cmpi eq, %81, %90 : vector<16x1xi32>
    %cst_41 = arith.constant 0.000000e+00 : f32
    %92 = vector.shape_cast %91 : vector<16x1xi1> to vector<16x1xi1>
    %93 = vector.broadcast %92 : vector<16x1xi1> to vector<16x128xi1>
    %94 = vector.broadcast %cst_41 : f32 to vector<16x128xf32>
    %95 = arith.select %93, %94, %89 : vector<16x128xi1>, vector<16x128xf32>
    %96 = arith.truncf %88 : vector<16x128xf32> to vector<16x128xbf16>
    %c144 = arith.constant 144 : index
    %c0_42 = arith.constant 0 : index
    %97 = vector.load %arg10[%c144, %c0_42] : memref<160x384xbf16, #tpu.memory_space<vmem>>, vector<16x128xbf16>
    tpu.vector_store %arg10[%c144, %c0_42], %96 {strides = array<i32>} : memref<160x384xbf16, #tpu.memory_space<vmem>>, vector<16x128xbf16>,
    %98 = arith.truncf %64 : vector<16x128xf32> to vector<16x128xbf16>
    %c144_43 = arith.constant 144 : index
    %c128_44 = arith.constant 128 : index
    %99 = vector.load %arg10[%c144_43, %c128_44] : memref<160x384xbf16, #tpu.memory_space<vmem>>, vector<16x128xbf16>
    tpu.vector_store %arg10[%c144_43, %c128_44], %98 {strides = array<i32>} : memref<160x384xbf16, #tpu.memory_space<vmem>>, vector<16x128xbf16>,
    %100 = arith.truncf %95 : vector<16x128xf32> to vector<16x128xbf16>
    %c144_45 = arith.constant 144 : index
    %c256_46 = arith.constant 256 : index
    %101 = vector.load %arg10[%c144_45, %c256_46] : memref<160x384xbf16, #tpu.memory_space<vmem>>, vector<16x128xbf16>
    tpu.vector_store %arg10[%c144_45, %c256_46], %100 {strides = array<i32>} : memref<160x384xbf16, #tpu.memory_space<vmem>>, vector<16x128xbf16>,
    %c0_47 = arith.constant 0 : index
    %c0_48 = arith.constant 0 : index
    %c0_49 = arith.constant 0 : index
    %c0_50 = arith.constant 0 : index
    %102 = vector.load %arg2[%c0_47, %c0_48, %c0_49, %c0_50] : memref<1x8x16x128xf32, #tpu.memory_space<vmem>>, vector<1x8x16x128xf32>
    %103 = vector.shape_cast %102 : vector<1x8x16x128xf32> to vector<8x16x128xf32>
    %104 = vector.shape_cast %103 : vector<8x16x128xf32> to vector<128x128xf32>
    %105 = arith.truncf %104 : vector<128x128xf32> to vector<128x128xbf16>
    %cst_51 = arith.constant dense<0.000000e+00> : vector<128x128xf32>
    %106 = tpu.matmul %105, %0, %cst_51 {dimension_numbers = #tpu.dot_dimension_numbers<[1], [0], [0], [1], [0, 0, 1, 1], [], []>} : vector<128x128xbf16>, vector<128x128xbf16>, vector<128x128xf32> -> vector<128x128xf32>
    %107 = vector.broadcast %1 : vector<1x128xf32> to vector<128x128xf32>
    %108 = arith.addf %106, %107 : vector<128x128xf32>
    %cst_52 = arith.constant 1.000000e-01 : f32
    %109 = vector.broadcast %cst_52 : f32 to vector<128x128xf32>
    %110 = arith.mulf %109, %108 : vector<128x128xf32>
    %111 = arith.maximumf %108, %110 : vector<128x128xf32>
    %112 = tpu.iota {dimensions = array<i32: 0>} : vector<128x1xi32>
    %c16_i32_53 = arith.constant 16 : i32
    %c0_i32_54 = arith.constant 0 : i32
    %113 = arith.cmpi eq, %c16_i32_53, %c0_i32_54 : i32
    %c1_i32_55 = arith.constant 1 : i32
    %114 = arith.select %113, %c1_i32_55, %c16_i32_53 : i32
    %115 = vector.broadcast %114 : i32 to vector<128x1xi32>
    %116 = arith.remsi %112, %115 : vector<128x1xi32>
    %c0_i32_56 = arith.constant 0 : i32
    %117 = vector.broadcast %c0_i32_56 : i32 to vector<128x1xi32>
    %118 = arith.cmpi ne, %116, %117 : vector<128x1xi32>
    %c0_i32_57 = arith.constant 0 : i32
    %119 = vector.broadcast %c0_i32_57 : i32 to vector<128x1xi32>
    %120 = arith.cmpi slt, %116, %119 : vector<128x1xi32>
    %c0_i32_58 = arith.constant 0 : i32
    %121 = arith.cmpi slt, %114, %c0_i32_58 : i32
    %122 = vector.broadcast %121 : i1 to vector<128x1xi1>
    %123 = vector.broadcast %122 : vector<128x1xi1> to vector<128x1xi1>
    %124 = arith.xori %120, %123 : vector<128x1xi1>
    %125 = arith.andi %124, %118 : vector<128x1xi1>
    %126 = vector.broadcast %114 : i32 to vector<128x1xi32>
    %127 = arith.addi %116, %126 : vector<128x1xi32>
    %128 = arith.select %125, %127, %116 : vector<128x1xi1>, vector<128x1xi32>
    %c1_i32_59 = arith.constant 1 : i32
    %129 = tpu.dynamic_rotate %111 by %c1_i32_59 dim 0 : vector<128x128xf32>, i32 -> vector<128x128xf32>
    %c0_i32_60 = arith.constant 0 : i32
    %130 = vector.broadcast %c0_i32_60 : i32 to vector<128x1xi32>
    %131 = arith.cmpi eq, %128, %130 : vector<128x1xi32>
    %cst_61 = arith.constant 0.000000e+00 : f32
    %132 = vector.shape_cast %131 : vector<128x1xi1> to vector<128x1xi1>
    %133 = vector.broadcast %132 : vector<128x1xi1> to vector<128x128xi1>
    %134 = vector.broadcast %cst_61 : f32 to vector<128x128xf32>
    %135 = arith.select %133, %134, %129 : vector<128x128xi1>, vector<128x128xf32>
    %c127_i32 = arith.constant 127 : i32
    %136 = tpu.dynamic_rotate %111 by %c127_i32 dim 0 : vector<128x128xf32>, i32 -> vector<128x128xf32>
    %c15_i32_62 = arith.constant 15 : i32
    %137 = vector.broadcast %c15_i32_62 : i32 to vector<128x1xi32>
    %138 = arith.cmpi eq, %128, %137 : vector<128x1xi32>
    %cst_63 = arith.constant 0.000000e+00 : f32
    %139 = vector.shape_cast %138 : vector<128x1xi1> to vector<128x1xi1>
    %140 = vector.broadcast %139 : vector<128x1xi1> to vector<128x128xi1>
    %141 = vector.broadcast %cst_63 : f32 to vector<128x128xf32>
    %142 = arith.select %140, %141, %136 : vector<128x128xi1>, vector<128x128xf32>
    %143 = arith.truncf %135 : vector<128x128xf32> to vector<128x128xbf16>
    %c16 = arith.constant 16 : index
    %c0_64 = arith.constant 0 : index
    %144 = vector.load %arg10[%c16, %c0_64] : memref<160x384xbf16, #tpu.memory_space<vmem>>, vector<128x128xbf16>
    tpu.vector_store %arg10[%c16, %c0_64], %143 {strides = array<i32>} : memref<160x384xbf16, #tpu.memory_space<vmem>>, vector<128x128xbf16>,
    %145 = arith.truncf %111 : vector<128x128xf32> to vector<128x128xbf16>
    %c16_65 = arith.constant 16 : index
    %c128_66 = arith.constant 128 : index
    %146 = vector.load %arg10[%c16_65, %c128_66] : memref<160x384xbf16, #tpu.memory_space<vmem>>, vector<128x128xbf16>
    tpu.vector_store %arg10[%c16_65, %c128_66], %145 {strides = array<i32>} : memref<160x384xbf16, #tpu.memory_space<vmem>>, vector<128x128xbf16>,
    %147 = arith.truncf %142 : vector<128x128xf32> to vector<128x128xbf16>
    %c16_67 = arith.constant 16 : index
    %c256_68 = arith.constant 256 : index
    %148 = vector.load %arg10[%c16_67, %c256_68] : memref<160x384xbf16, #tpu.memory_space<vmem>>, vector<128x128xbf16>
    tpu.vector_store %arg10[%c16_67, %c256_68], %147 {strides = array<i32>} : memref<160x384xbf16, #tpu.memory_space<vmem>>, vector<128x128xbf16>,
    %c0_69 = arith.constant 0 : index
    %c0_70 = arith.constant 0 : index
    %149 = vector.load %arg10[%c0_69, %c0_70] : memref<160x384xbf16, #tpu.memory_space<vmem>>, vector<128x384xbf16>
    %c0_71 = arith.constant 0 : index
    %c0_72 = arith.constant 0 : index
    %c0_73 = arith.constant 0 : index
    %150 = vector.load %arg7[%c0_71, %c0_72, %c0_73] : memref<3x384x128xbf16, #tpu.memory_space<vmem>>, vector<1x384x128xbf16>
    %151 = vector.shape_cast %150 : vector<1x384x128xbf16> to vector<384x128xbf16>
    %cst_74 = arith.constant dense<0.000000e+00> : vector<128x128xf32>
    %152 = tpu.matmul %149, %151, %cst_74 {dimension_numbers = #tpu.dot_dimension_numbers<[1], [0], [0], [1], [0, 0, 1, 1], [], []>} : vector<128x384xbf16>, vector<384x128xbf16>, vector<128x128xf32> -> vector<128x128xf32>
    %c16_75 = arith.constant 16 : index
    %c0_76 = arith.constant 0 : index
    %153 = vector.load %arg10[%c16_75, %c0_76] : memref<160x384xbf16, #tpu.memory_space<vmem>>, vector<128x384xbf16>
    %c1 = arith.constant 1 : index
    %c0_77 = arith.constant 0 : index
    %c0_78 = arith.constant 0 : index
    %154 = vector.load %arg7[%c1, %c0_77, %c0_78] : memref<3x384x128xbf16, #tpu.memory_space<vmem>>, vector<1x384x128xbf16>
    %155 = vector.shape_cast %154 : vector<1x384x128xbf16> to vector<384x128xbf16>
    %cst_79 = arith.constant dense<0.000000e+00> : vector<128x128xf32>
    %156 = tpu.matmul %153, %155, %cst_79 {dimension_numbers = #tpu.dot_dimension_numbers<[1], [0], [0], [1], [0, 0, 1, 1], [], []>} : vector<128x384xbf16>, vector<384x128xbf16>, vector<128x128xf32> -> vector<128x128xf32>
    %157 = arith.addf %152, %156 : vector<128x128xf32>
    %c32 = arith.constant 32 : index
    %c0_80 = arith.constant 0 : index
    %158 = vector.load %arg10[%c32, %c0_80] : memref<160x384xbf16, #tpu.memory_space<vmem>>, vector<128x384xbf16>
    %c2 = arith.constant 2 : index
    %c0_81 = arith.constant 0 : index
    %c0_82 = arith.constant 0 : index
    %159 = vector.load %arg7[%c2, %c0_81, %c0_82] : memref<3x384x128xbf16, #tpu.memory_space<vmem>>, vector<1x384x128xbf16>
    %160 = vector.shape_cast %159 : vector<1x384x128xbf16> to vector<384x128xbf16>
    %cst_83 = arith.constant dense<0.000000e+00> : vector<128x128xf32>
    %161 = tpu.matmul %158, %160, %cst_83 {dimension_numbers = #tpu.dot_dimension_numbers<[1], [0], [0], [1], [0, 0, 1, 1], [], []>} : vector<128x384xbf16>, vector<384x128xbf16>, vector<128x128xf32> -> vector<128x128xf32>
    %162 = arith.addf %157, %161 : vector<128x128xf32>
    %c0_84 = arith.constant 0 : index
    %c0_85 = arith.constant 0 : index
    %163 = vector.load %arg8[%c0_84, %c0_85] : memref<1x128xf32, #tpu.memory_space<vmem>>, vector<1x128xf32>
    %164 = vector.broadcast %163 : vector<1x128xf32> to vector<128x128xf32>
    %165 = arith.addf %162, %164 : vector<128x128xf32>
    %cst_86 = arith.constant 1.000000e-01 : f32
    %166 = vector.broadcast %cst_86 : f32 to vector<128x128xf32>
    %167 = arith.mulf %166, %165 : vector<128x128xf32>
    %168 = arith.maximumf %165, %167 : vector<128x128xf32>
    %c0_87 = arith.constant 0 : index
    %c0_88 = arith.constant 0 : index
    %c0_89 = arith.constant 0 : index
    %c0_90 = arith.constant 0 : index
    %169 = vector.load %arg2[%c0_87, %c0_88, %c0_89, %c0_90] : memref<1x8x16x128xf32, #tpu.memory_space<vmem>>, vector<1x8x16x128xf32>
    %170 = vector.shape_cast %169 : vector<1x8x16x128xf32> to vector<8x16x128xf32>
    %171 = vector.shape_cast %170 : vector<8x16x128xf32> to vector<128x128xf32>
    %172 = arith.addf %168, %171 : vector<128x128xf32>
    %173 = vector.shape_cast %172 : vector<128x128xf32> to vector<8x16x128xf32>
    %c0_91 = arith.constant 0 : index
    %c0_92 = arith.constant 0 : index
    %c0_93 = arith.constant 0 : index
    %c0_94 = arith.constant 0 : index
    %174 = vector.load %arg9[%c0_91, %c0_92, %c0_93, %c0_94] : memref<1x8x16x128xf32, #tpu.memory_space<vmem>>, vector<1x8x16x128xf32>
    %175 = vector.shape_cast %174 : vector<1x8x16x128xf32> to vector<8x16x128xf32>
    %176 = vector.shape_cast %173 : vector<8x16x128xf32> to vector<1x8x16x128xf32>
    tpu.vector_store %arg9[%c0_91, %c0_92, %c0_93, %c0_94], %176 {strides = array<i32>} : memref<1x8x16x128xf32, #tpu.memory_space<vmem>>, vector<1x8x16x128xf32>,
    return
  }
  func.func @transform_0(%arg0: i32, %arg1: i32) -> (i32, i32, i32, i32) {
    %c0_i32 = arith.constant 0 : i32
    %c0_i32_0 = arith.constant 0 : i32
    %c0_i32_1 = arith.constant 0 : i32
    return %arg0, %arg1, %c0_i32, %c0_i32_0 : i32, i32, i32, i32
  }
  func.func @transform_1(%arg0: i32, %arg1: i32) -> (i32, i32, i32, i32) {
    %c8_i32 = arith.constant 8 : i32
    %0 = arith.muli %arg1, %c8_i32 : i32
    %c1_i32 = arith.constant 1 : i32
    %1 = arith.subi %0, %c1_i32 : i32
    %c0_i32 = arith.constant 0 : i32
    %2 = arith.maxsi %1, %c0_i32 : i32
    %c0_i32_0 = arith.constant 0 : i32
    %c0_i32_1 = arith.constant 0 : i32
    %c0_i32_2 = arith.constant 0 : i32
    return %arg0, %2, %c0_i32_0, %c0_i32_1 : i32, i32, i32, i32
  }
  func.func @transform_2(%arg0: i32, %arg1: i32) -> (i32, i32, i32, i32) {
    %c1_i32 = arith.constant 1 : i32
    %0 = arith.addi %arg1, %c1_i32 : i32
    %c8_i32 = arith.constant 8 : i32
    %1 = arith.muli %0, %c8_i32 : i32
    %c15_i32 = arith.constant 15 : i32
    %2 = arith.minsi %1, %c15_i32 : i32
    %c0_i32 = arith.constant 0 : i32
    %c0_i32_0 = arith.constant 0 : i32
    %c0_i32_1 = arith.constant 0 : i32
    return %arg0, %2, %c0_i32, %c0_i32_0 : i32, i32, i32, i32
  }
  func.func @transform_3(%arg0: i32, %arg1: i32) -> (i32, i32) {
    %c0_i32 = arith.constant 0 : i32
    %c0_i32_0 = arith.constant 0 : i32
    %c0_i32_1 = arith.constant 0 : i32
    return %c0_i32, %c0_i32_0 : i32, i32
  }
  func.func @transform_4(%arg0: i32, %arg1: i32) -> (i32, i32) {
    %c0_i32 = arith.constant 0 : i32
    %c0_i32_0 = arith.constant 0 : i32
    %c0_i32_1 = arith.constant 0 : i32
    return %c0_i32, %c0_i32_0 : i32, i32
  }
  func.func @transform_5(%arg0: i32, %arg1: i32) -> (i32, i32, i32) {
    %c0_i32 = arith.constant 0 : i32
    %c0_i32_0 = arith.constant 0 : i32
    %c0_i32_1 = arith.constant 0 : i32
    %c0_i32_2 = arith.constant 0 : i32
    return %c0_i32, %c0_i32_0, %c0_i32_1 : i32, i32, i32
  }
  func.func @transform_6(%arg0: i32, %arg1: i32) -> (i32, i32) {
    %c0_i32 = arith.constant 0 : i32
    %c0_i32_0 = arith.constant 0 : i32
    %c0_i32_1 = arith.constant 0 : i32
    return %c0_i32, %c0_i32_0 : i32, i32
  }
  func.func @transform_7(%arg0: i32, %arg1: i32) -> (i32, i32, i32, i32) {
    %c0_i32 = arith.constant 0 : i32
    %c0_i32_0 = arith.constant 0 : i32
    %c0_i32_1 = arith.constant 0 : i32
    return %arg0, %arg1, %c0_i32, %c0_i32_0 : i32, i32, i32, i32
  }
}

</mosaic_0001>

<bundles_post_ra>
// kernel: tpu_custom_call.1
= control target key start
LH: loop header
LB: loop body
LE: loop exit
PB: predicated region body
PF: predicated region fallthrough
CT: control target
= control target key end

     0   :  { %s5807_s0 = inlined_call_operand.hbm [shape: f32[2,16,16,128], index: 0, kind: input, shape index: {}]   ;;  %s5808_s1 = inlined_call_operand.hbm [shape: f32[2,16,16,128], index: 1, kind: input, shape index: {}]   ;;  %s5809_s2 = inlined_call_operand.hbm [shape: f32[2,16,16,128], index: 2, kind: input, shape index: {}]   ;;  %s5810_s3 = inlined_call_operand.hbm [shape: bf16[128,128], index: 3, kind: input, shape index: {}]   ;;  %s5811_s4 = inlined_call_operand.vmem [shape: f32[1,128], index: 4, kind: input, shape index: {}]   ;;  %s5812_s5 = inlined_call_operand.hbm [shape: bf16[3,384,128], index: 5, kind: input, shape index: {}]   ;;  %s5813_s6 = inlined_call_operand.vmem [shape: f32[1,128], index: 6, kind: input, shape index: {}]   ;;  %s5814_s7 = inlined_call_operand.hbm [shape: f32[2,16,16,128], index: 7, kind: output, shape index: {}]  }
   0x1   :  { %5869 = sst [smem:[#allocation40_spill]] %s5807_s0 }
   0x2   :  { %5870 = sst [smem:[#allocation41_spill]] %s5808_s1 }
   0x3   :  { %5871 = sst [smem:[#allocation42_spill]] %s5809_s2 }
   0x4   :  { %5872 = sst [smem:[#allocation43_spill]] %s5810_s3 }
   0x5   :  { %5873 = sst [smem:[#allocation44_spill]] %s5811_s4 }
   0x6   :  { %5874 = sst [smem:[#allocation45_spill]] %s5812_s5 }
   0x7   :  { %5875 = sst [smem:[#allocation46_spill]] %s5813_s6 }
   0x8   :  { %5876 = sst [smem:[#allocation47_spill]] %s5814_s7 }
   0x9   :  { %12 = vsyncpa [#allocation4], 0 }
   0xa   :  { %14 = vsyncpa [#allocation4 + $0x1], 0 }
   0xb   :  { %15 = vsyncpa [#allocation7], 0 }
   0xc   :  { %17 = vsyncpa [#allocation7 + $0x1], 0 }
   0xd   :  { %18 = vsyncpa [#allocation10], 0 }
   0xe   :  { %19 = vsyncpa [#allocation5], 0 }
   0xf   :  { %21 = vsyncpa [#allocation5 + $0x1], 0  ;;  %s4268_s24 = smov 0   ;;  %s4270_s25 = smov 0  }
  0x10   :  { %s4272_s26 = smov 0   ;;  %s4274_s27 = smov 0  }
  0x11   :  { %s4276_s28 = smov 0   ;;  %s4278_s29 = smov 0  }
  0x12   :  { %s4280_s30 = smov 0   ;;  %s4282_s8 = smov 0  }
  0x13   :  { %s4284_s9 = smov 0   ;;  %s4286_s10 = smov 0  }
  0x14   :  { %s4288_s11 = smov 0   ;;  %s4290_s12 = smov 0  }
  0x15   :  { %s4292_s13 = smov 0   ;;  %s4294_s14 = smov 0  }
  0x16 LB: > { %5877 = sst [smem:[#allocation18_spill]] %s4159_s24  ;;  %s4339_s15 = sadd.s32 4294967295, %s4211_s14   ;;  %s4211_s14 = sphi %s4294_s14, %s27_s14   ;;  %s4207_s13 = sphi %s4292_s13, %s6066_s13   ;;  %s4203_s12 = sphi %s4290_s12, %s6065_s12   ;;  %s4199_s11 = sphi %s4288_s11, %s6064_s11   ;;  %s4195_s10 = sphi %s4286_s10, %s6074_s10   ;;  %s4191_s9 = sphi %s4284_s9, %s6073_s9   ;;  %s4187_s8 = sphi %s4282_s8, %s6072_s8   ;;  %s4183_s30 = sphi %s4280_s30, %s6071_s30   ;;  %s4179_s29 = sphi %s4278_s29, %s6070_s29   ;;  %s4175_s28 = sphi %s4276_s28, %s6069_s28   ;;  %s4171_s27 = sphi %s4274_s27, %s6068_s27   ;;  %s4167_s26 = sphi %s4272_s26, %s6067_s26   ;;  %s4163_s25 = sphi %s4270_s25, %s6059_s25   ;;  %s4159_s24 = sphi %s4268_s24, %s6058_s24  }
  0x17   : > { %5878 = sst [smem:[#allocation19_spill]] %s4163_s25  ;;  %p2797_p0 = scmp.ge.s32.totalorder %s4211_s14, 1 }
  0x18   : > { %5879 = sst [smem:[#allocation20_spill]] %s4167_s26  ;;  %p5816_p1 = scmp.eq.s32.totalorder %s4339_s15, 0 }
  0x19   : > { %5880 = sst [smem:[#allocation21_spill]] %s4175_s28  ;;  %p256_p3 = scmp.lt.s32.totalorder %s4211_s14, 5 }
  0x1a   : > { %5881 = sst [smem:[#allocation22_spill]] %s4195_s10  ;;  %s4213_s17 = smov [#allocation9]  }
  0x1b   : > { %5882 = sst [smem:[#allocation23_spill]] %s4199_s11  ;;  %p4345_p4 = pnand %p2797_p0, %p256_p3 }
  0x1c   : > { %5883 = sst [smem:[#allocation24_spill]] %s4203_s12  ;;  %s268_s18 = sshll.u32 %s4213_s17, 4  ;;  %s269_s18 = int_to_ptr.vmem [resolvable:$true] %s268_s18 }
  0x1d   : > { %5884 = sst [smem:[#allocation25_spill]] %s4207_s13  ;;  %p3661_p5 = pneg %p4345_p4 }
  0x1e   : > { %s5885_s16 = scalar_select %p4345_p4, 1, 0 }
  0x1f   : > { %p4353_p6 = pnand %p3661_p5, %p5816_p1  ;;  %s5888_s3 = sld [smem:[#allocation43_spill]] }
  0x20   : > { %5886 = sst [smem:[#allocation26_spill]] %s5885_s16 }
  0x21   : > { %p5833_p8 = pneg %p4353_p6 }
  0x25   : > { %s3907_s22 = scalar_lea.hbm %s5888_s3, 1024 }
  0x26   : > { %p3908_p7 = scmp.ne.s32.totalorder %s5888_s3, %s3907_s22  ;;  %p3914_p11 = scmp.lt.u32.totalorder %s3907_s22, %s5888_s3 }
  0x28   : > { %p3910_p9 = pnand %p5833_p8, %p3908_p7 }
  0x2a   : > { %p3911_p10 = pneg %p3910_p9 }
  0x2c   : > { %p3916_p12 = pnand %p3914_p11, %p3911_p10 }
  0x2e   : > { %3919 = shalt.err (!%p3916_p12)
}
  0x2f   : > { %s3920_s20 = scalar_lea.vmem %s269_s18, 1024  ;;  %p3928_p5 = scmp.lt.s32.totalorder %s269_s18, %s269_s18 }
  0x30   : > { %p3921_p13 = scmp.ne.s32.totalorder %s269_s18, %s3920_s20  ;;  %p3929_p2 = scmp.lt.s32.totalorder %s3920_s20, %s3920_s20 }
  0x32   : > { %p3923_p0 = pnand %p3921_p13, %p5833_p8  ;;  %p3930_p1 = por %p3929_p2, %p3928_p5 }
  0x34   : > { %p3924_p3 = pneg %p3923_p0 }
  0x36   : > { %p3931_p4 = pnand %p3930_p1, %p3924_p3 }
  0x38   : > { %3934 = shalt.err (!%p3931_p4)
}
  0x39   : > { %s5819_s7 = smov 64   ;;  %s5820_s11 = smov 4  }
  0x3a   : > { %3664 = dma.hbm_to_vmem [thread:$0]  (!%p4353_p6), %s5888_s3, 1024, %s269_s18, [#allocation10], %s5819_s7, %s5819_s7, %s5820_s11  }
  0x3b   : > { %s36_s23 = sadd.s32 1, %s4203_s12  ;;  %s39_s17 = sadd.s32 1, %s4207_s13 }
  0x3c   : > { %p37_p1 = scmp.ge.s32.totalorder %s36_s23, 2  ;;  %p5832_p2 = scmp.eq.s32.totalorder %s4211_s14, 0 }
  0x3d   : > { %s2791_s20 = sshll.u32 %s4203_s12, 3  ;;  %s84_s6 = sadd.s32 1, %s4179_s29 }
  0x3e   : > { %s6076_s23 = smov (%p37_p1, %s36_s23), 0  ;;  %s6078_s17 = smov (!%p37_p1, %s39_s17), %s4207_s13 }
  0x3f   : > { %5889 = sst [smem:[#allocation27_spill]] %s6076_s23  ;;  %s44_s4 = ssub.s32 %s4203_s12, %s6076_s23 }
  0x40   : > { %s2792_s10 = sadd.s32 4294967295, %s2791_s20  ;;  %p41_p4 = scmp.ge.s32.totalorder %s6078_s17, 2 }
  0x41   : > { %p73_p7 = scmp.gt.s32.totalorder %s2792_s10, 0  ;;  %s2793_s18 = sshll.u32 %s6076_s23, 3 }
  0x42   : > { %p91_p9 = scmp.ne.s32.totalorder %s4179_s29, %s4175_s28  ;;  %s6080_s17 = smov (%p41_p4, %s6078_s17), 0 }
  0x43   : > { %5890 = sst [smem:[#allocation28_spill]] %s6080_s17  ;;  %s6082_s10 = smov (!%p73_p7, %s2792_s10), 0 }
  0x44   : > { %s4399_s21 = ssub.s32 %s4207_s13, %s6080_s17  ;;  %s2794_s22 = sadd.s32 4294967295, %s2793_s18 }
  0x45   : > { %5891 = sst [smem:[#allocation29_spill]] %s4399_s21  ;;  %s4402_s7 = sor.u32 %s44_s4, %s4399_s21 }
  0x46   : > { %p77_p10 = scmp.gt.s32.totalorder %s2794_s22, 0  ;;  %p4407_p12 = por %p91_p9, %p5832_p2 }
  0x47   : > { %p97_p13 = scmp.ne.s32.totalorder %s4175_s28, %s4171_s27  ;;  %s4413_s3 = sadd.s32 8, %s2791_s20 }
  0x48   : > { %s6084_s22 = smov (!%p77_p10, %s2794_s22), 0  ;;  %p5893_p3 = scmp.eq.s32.totalorder %s4339_s15, 0 }
  0x49   : > { %s80_s17 = ssub.s32 %s6082_s10, %s6084_s22  ;;  %s4423_s16 = sadd.s32 8, %s2793_s18 }
  0x4a   : > { %s81_s4 = sor.u32 %s80_s17, %s4399_s21  ;;  %p4419_p5 = por %p97_p13, %p5893_p3 }
  0x4b   : > { %p82_p1 = scmp.eq.s32.totalorder %s81_s4, 0  ;;  %p5831_p7 = scmp.lt.s32.totalorder %s4211_s14, 4 }
  0x4c   : > { %s5894_s23 = scalar_select %p4419_p5, 1, 0 }
  0x4d   : > { %s4428_s27 = scalar_select %p82_p1, %s4179_s29, %s84_s6  }
  0x4e   : > { %5895 = sst [smem:[#allocation30_spill]] %s5894_s23  ;;  %s4431_s20 = sshll.u32 %s4207_s13, 5 }
  0x4f   : > { %s325_s22 = sand.u32 1, %s4211_s14   ;;  %s327_s17 = sand.u32 1, %s4179_s29  }
  0x50   : > { %s2806_s28 = sshll.u32 %s327_s17, 4  ;;  %s2809_s2 = sshll.u32 %s6082_s10, 1 }
  0x51   : > { %s339_s21 = sadd.s32 %s2809_s2, %s4431_s20  ;;  %s329_s23 = scalar_lea.vmem [#allocation6], %s2806_s28 }
  0x52   : > { %s2811_s24 = sshll.u32 %s339_s21, 7  ;;  %s342_s4 = sshll.u32 %s329_s23, 4  ;;  %s4441_s4 = int_to_ptr.vmem [resolvable:$true] %s342_s4 }
  0x53   : > { %s5896_s1 = sld [smem:[#allocation41_spill]]  ;;  %p4447_p9 = pnand %p5831_p7, %p4407_p12 }
  0x54   : > { %s4216_s2 = smov [#allocation11]  }
  0x55   : > { %s284_s28 = sshll.u32 %s4216_s2, 4  ;;  %p3937_p13 = pneg %p4447_p9  ;;  %s4451_s28 = int_to_ptr.vmem [resolvable:$true] %s284_s28 }
  0x59   : > { %s4439_s18 = scalar_lea.hbm %s5896_s1, %s2811_s24  ;;  %s4453_s24 = scalar_lea.sflag [#allocation7], %s325_s22 }
  0x5a   : > { %s3935_s25 = scalar_lea.hbm %s4439_s18, 256  ;;  %s3940_s11 = scalar_lea.hbm %s5896_s1, 8192 }
  0x5b   : > { %p3936_p10 = scmp.ne.s32.totalorder %s4439_s18, %s3935_s25  ;;  %p3941_p12 = scmp.lt.u32.totalorder %s4439_s18, %s5896_s1 }
  0x5c   : > { %p3942_p4 = scmp.lt.u32.totalorder %s3940_s11, %s3935_s25  ;;  %p3944_p7 = scmp.lt.u32.totalorder %s3935_s25, %s4439_s18 }
  0x5d   : > { %p3938_p3 = pnand %p3937_p13, %p3936_p10 }
  0x5e   : > { %p3943_p0 = por %p3942_p4, %p3941_p12 }
  0x5f   : > { %p3939_p1 = pneg %p3938_p3 }
  0x60   : > { %p3945_p2 = por %p3944_p7, %p3943_p0 }
  0x62   : > { %p3946_p11 = pnand %p3945_p2, %p3939_p1 }
  0x64   : > { %3949 = shalt.err (!%p3946_p11)
}
  0x65   : > { %s3950_s22 = scalar_lea.vmem %s4441_s4, 256  ;;  %s4217_s17 = smov [#allocation6]  }
  0x66   : > { %p3951_p10 = scmp.ne.s32.totalorder %s4441_s4, %s3950_s22  ;;  %s3955_s2 = sshll.u32 %s4217_s17, 4  ;;  %s3956_s2 = int_to_ptr.vmem [resolvable:$false] %s3955_s2 }
  0x67   : > { %s3957_s26 = scalar_lea.vmem %s3956_s2, 512  ;;  %p3958_p5 = scmp.lt.s32.totalorder %s4441_s4, %s3956_s2 }
  0x68   : > { %p3953_p3 = pnand %p3951_p10, %p3937_p13  ;;  %p3959_p4 = scmp.lt.s32.totalorder %s3957_s26, %s3950_s22 }
  0x6a   : > { %p3954_p8 = pneg %p3953_p3  ;;  %p3960_p12 = por %p3959_p4, %p3958_p5 }
  0x6c   : > { %p3961_p0 = pnand %p3960_p12, %p3954_p8 }
  0x6e   : > { %3964 = shalt.err (!%p3961_p0)
}
  0x6f   : > { %s5835_s25 = smov 128   ;;  %s5837_s10 = smov 8  }
  0x70   : > { %3674 = dma.hbm_to_vmem [thread:$0]  (!%p4447_p9), %s4439_s18, 256, %s4441_s4, %s4453_s24, %s5835_s25, %s5835_s25, %s5837_s10  }
  0x71   : > { %s5898_s5 = sld [smem:[#allocation45_spill]]  ;;  %p5899_p2 = pneg %p4353_p6 }
  0x77   : > { %s3965_s21 = scalar_lea.hbm %s5898_s5, 9216 }
  0x78   : > { %p3966_p8 = scmp.ne.s32.totalorder %s5898_s5, %s3965_s21  ;;  %p3972_p7 = scmp.lt.u32.totalorder %s3965_s21, %s5898_s5 }
  0x7a   : > { %p3968_p11 = pnand %p3966_p8, %p5899_p2 }
  0x7c   : > { %p3969_p5 = pneg %p3968_p11 }
  0x7e   : > { %p3974_p13 = pnand %p3972_p7, %p3969_p5 }
  0x80   : > { %3977 = shalt.err (!%p3974_p13)
}
  0x81   : > { %s3978_s4 = scalar_lea.vmem %s4451_s28, 9216  ;;  %p5900_p1 = pmov %p5899_p2 }
  0x82   : > { %p3979_p9 = scmp.ne.s32.totalorder %s4451_s28, %s3978_s4  ;;  %p3986_p4 = scmp.lt.s32.totalorder %s4451_s28, %s4451_s28 }
  0x83   : > { %p3987_p12 = scmp.lt.s32.totalorder %s3978_s4, %s3978_s4 }
  0x84   : > { %p3981_p10 = pnand %p3979_p9, %p5900_p1 }
  0x85   : > { %p3988_p0 = por %p3987_p12, %p3986_p4 }
  0x86   : > { %p3982_p3 = pneg %p3981_p10 }
  0x88   : > { %p3989_p8 = pnand %p3988_p0, %p3982_p3 }
  0x8a   : > { %3992 = shalt.err (!%p3989_p8)
}
  0x8b   : > { %s5901_s18 = smov 4   ;;  %s5902_s6 = smov 64  }
  0x8c   : > { %3667 = dma.hbm_to_vmem [thread:$0]  (!%p4353_p6), %s5898_s5, 9216, %s4451_s28, [#allocation10], %s5902_s6, %s5902_s6, %s5901_s18  }
  0x8d   : > { %s2790_s19 = sadd.s32 4294967294, %s4211_s14   ;;  %s48_s21 = sadd.s32 1, %s4191_s9 }
  0x8e   : > { %p55_p2 = scmp.ne.s32.totalorder %s4191_s9, %s4187_s8  ;;  %p5903_p11 = scmp.eq.s32.totalorder %s4402_s7, 0 }
  0x8f   : > { %p5905_p5 = scmp.eq.s32.totalorder %s4211_s14, 0  ;;  %p61_p13 = scmp.ne.s32.totalorder %s4187_s8, %s4183_s30 }
  0x90   : > { %s4519_s22 = scalar_select %p5903_p11, %s4191_s9, %s48_s21  }
  0x91   : > { %p4523_p7 = por %p5905_p5, %p55_p2  ;;  %p5907_p9 = scmp.eq.s32.totalorder %s4339_s15, 3 }
  0x92   : > { %5904 = sst [smem:[#allocation31_spill]] %s4519_s22  ;;  %p249_p6 = scmp.eq.s32.totalorder %s2790_s19, 3 }
  0x93   : > { %p4531_p1 = por %p5907_p9, %p55_p2  ;;  %p5909_p10 = scmp.eq.s32.totalorder %s4339_s15, 0 }
  0x94   : > { %s301_s7 = sand.u32 1, %s4191_s9   ;;  %p4542_p4 = por %p249_p6, %p61_p13 }
  0x95   : > { %s5908_s2 = scalar_select %p4531_p1, 1, 0 }
  0x96   : > { %p4537_p3 = por %p5909_p10, %p61_p13  ;;  %s2801_s4 = sshll.u32 %s301_s7, 7 }
  0x97   : > { %s5911_s26 = scalar_select %p4542_p4, 1, 0 }
  0x98   : > { %s2917_s18 = sshll.u32 %s4203_s12, 4  ;;  %s305_s23 = scalar_lea.vmem [#allocation3], %s2801_s4 }
  0x99   : > { %s312_s6 = sadd.s32 %s2917_s18, %s4431_s20  ;;  %s315_s21 = sshll.u32 %s305_s23, 4  ;;  %s4553_s21 = int_to_ptr.vmem [resolvable:$true] %s315_s21 }
  0x9a   : > { %s2805_s11 = sshll.u32 %s312_s6, 7  ;;  %s5912_s0 = sld [smem:[#allocation40_spill]] }
  0x9b   : > { %p5913_p12 = scmp.lt.s32.totalorder %s4211_s14, 4  ;;  %s4563_s4 = scalar_lea.sflag [#allocation4], %s301_s7 }
  0x9d   : > { %p4559_p0 = pnand %p5913_p12, %p4523_p7 }
  0x9f   : > { %p3995_p2 = pneg %p4559_p0 }
  0xa0   : > { %s4551_s19 = scalar_lea.hbm %s5912_s0, %s2805_s11  ;;  %s3998_s17 = scalar_lea.hbm %s5912_s0, 8192 }
  0xa1   : > { %s3993_s18 = scalar_lea.hbm %s4551_s19, 2048  ;;  %p3999_p7 = scmp.lt.u32.totalorder %s4551_s19, %s5912_s0 }
  0xa2   : > { %p3994_p8 = scmp.ne.s32.totalorder %s4551_s19, %s3993_s18  ;;  %p4000_p13 = scmp.lt.u32.totalorder %s3998_s17, %s3993_s18 }
  0xa3   : > { %p4002_p6 = scmp.lt.u32.totalorder %s3993_s18, %s4551_s19 }
  0xa4   : > { %p3996_p11 = pnand %p3995_p2, %p3994_p8  ;;  %p4001_p9 = por %p4000_p13, %p3999_p7 }
  0xa6   : > { %p3997_p5 = pneg %p3996_p11  ;;  %p4003_p10 = por %p4002_p6, %p4001_p9 }
  0xa8   : > { %p4004_p12 = pnand %p4003_p10, %p3997_p5 }
  0xaa   : > { %4007 = shalt.err (!%p4004_p12)
}
  0xab   : > { %s4008_s7 = scalar_lea.vmem %s4553_s21, 2048  ;;  %s4220_s23 = smov [#allocation3]  }
  0xac   : > { %p4009_p8 = scmp.ne.s32.totalorder %s4553_s21, %s4008_s7  ;;  %s4013_s25 = sshll.u32 %s4220_s23, 4  ;;  %s4014_s25 = int_to_ptr.vmem [resolvable:$false] %s4013_s25 }
  0xad   : > { %s4015_s10 = scalar_lea.vmem %s4014_s25, 4096  ;;  %p4016_p1 = scmp.lt.s32.totalorder %s4553_s21, %s4014_s25 }
  0xae   : > { %p4011_p11 = pnand %p4009_p8, %p3995_p2  ;;  %p4017_p7 = scmp.lt.s32.totalorder %s4015_s10, %s4008_s7 }
  0xb0   : > { %p4012_p4 = pneg %p4011_p11  ;;  %p4018_p13 = por %p4017_p7, %p4016_p1 }
  0xb2   : > { %p4019_p9 = pnand %p4018_p13, %p4012_p4 }
  0xb4   : > { %4022 = shalt.err (!%p4019_p9)
}
  0xb5   : > { %s5915_s18 = smov 8   ;;  %s5916_s17 = smov 128  }
  0xb6   : > { %s5917_s6 = sld [smem:[#allocation20_spill]]  ;;  %s5918_s11 = sld [smem:[#allocation19_spill]] }
  0xb7   : > { %s5919_s23 = sld [smem:[#allocation18_spill]]  ;;  %s5920_s7 = sld [smem:[#allocation29_spill]] }
  0xb8   : > { %3671 = dma.hbm_to_vmem [thread:$0]  (!%p4559_p0), %s4551_s19, 2048, %s4553_s21, %s4563_s4, %s5916_s17, %s5916_s17, %s5915_s18  }
  0xb9   : > { %p5921_p1 = scmp.lt.s32.totalorder %s4413_s3, 15  ;;  %p5922_p4 = scmp.lt.s32.totalorder %s4423_s16, 15 }
  0xba   : > { %p5923_p6 = scmp.eq.s32.totalorder %s4211_s14, 0  ;;  %p5925_p8 = scmp.eq.s32.totalorder %s4339_s15, 0 }
  0xbb   : > { %s6086_s3 = smov (!%p5921_p1, %s4413_s3), 15  ;;  %s6088_s16 = smov (!%p5922_p4, %s4423_s16), 15 }
  0xbc   : > { %s120_s1 = sadd.s32 1, %s5917_s6  ;;  %p127_p2 = scmp.ne.s32.totalorder %s5917_s6, %s5918_s11 }
  0xbd   : > { %s116_s25 = ssub.s32 %s6086_s3, %s6088_s16  ;;  %p133_p5 = scmp.ne.s32.totalorder %s5918_s11, %s5919_s23 }
  0xbe   : > { %s117_s10 = sor.u32 %s116_s25, %s5920_s7  ;;  %p4608_p10 = por %p127_p2, %p5923_p6 }
  0xbf   : > { %p118_p12 = scmp.eq.s32.totalorder %s117_s10, 0  ;;  %p4614_p11 = por %p133_p5, %p5925_p8 }
  0xc0   : > { %s354_s19 = sand.u32 1, %s5917_s6   ;;  %s2814_s4 = sshll.u32 %s6086_s3, 1 }
  0xc1   : > { %s5926_s21 = scalar_select %p4614_p11, 1, 0 }
  0xc2   : > { %s6090_s6 = smov (!%p118_p12, %s5917_s6), %s120_s1  ;;  %s2812_s16 = sshll.u32 %s354_s19, 4 }
  0xc3   : > { %s366_s5 = sadd.s32 %s2814_s4, %s4431_s20  ;;  %s5927_s25 = sld [smem:[#allocation42_spill]] }
  0xc4   : > { %s2816_s11 = sshll.u32 %s366_s5, 7  ;;  %s356_s10 = scalar_lea.vmem [#allocation8], %s2812_s16 }
  0xc5   : > { %s369_s12 = sshll.u32 %s356_s10, 4  ;;  %p5929_p0 = scmp.lt.s32.totalorder %s4211_s14, 4  ;;  %s4628_s12 = int_to_ptr.vmem [resolvable:$true] %s369_s12 }
  0xc7   : > { %p4634_p7 = pnand %p5929_p0, %p4608_p10 }
  0xc9   : > { %s5928_s22 = smov %s5927_s25  ;;  %s4626_s13 = scalar_lea.hbm %s5927_s25, %s2816_s11 }
  0xca   : > { %s4023_s5 = scalar_lea.hbm %s4626_s13, 256  ;;  %p4025_p9 = pneg %p4634_p7 }
  0xcb   : > { %p4024_p13 = scmp.ne.s32.totalorder %s4626_s13, %s4023_s5  ;;  %s4028_s19 = scalar_lea.hbm %s5928_s22, 8192 }
  0xcc   : > { %p4029_p2 = scmp.lt.u32.totalorder %s4626_s13, %s5928_s22  ;;  %p4030_p5 = scmp.lt.u32.totalorder %s4028_s19, %s4023_s5 }
  0xcd   : > { %p4026_p1 = pnand %p4025_p9, %p4024_p13  ;;  %p4032_p10 = scmp.lt.u32.totalorder %s4023_s5, %s4626_s13 }
  0xce   : > { %p4031_p6 = por %p4030_p5, %p4029_p2 }
  0xcf   : > { %p4027_p4 = pneg %p4026_p1 }
  0xd0   : > { %p4033_p12 = por %p4032_p10, %p4031_p6 }
  0xd2   : > { %p4034_p8 = pnand %p4033_p12, %p4027_p4 }
  0xd4   : > { %4037 = shalt.err (!%p4034_p8)
}
  0xd5   : > { %s4038_s16 = scalar_lea.vmem %s4628_s12, 256  ;;  %s4221_s11 = smov [#allocation8]  }
  0xd6   : > { %p4039_p0 = scmp.ne.s32.totalorder %s4628_s12, %s4038_s16  ;;  %s4043_s23 = sshll.u32 %s4221_s11, 4  ;;  %s4044_s23 = int_to_ptr.vmem [resolvable:$false] %s4043_s23 }
  0xd7   : > { %s4045_s7 = scalar_lea.vmem %s4044_s23, 512  ;;  %p4046_p11 = scmp.lt.s32.totalorder %s4628_s12, %s4044_s23 }
  0xd8   : > { %p4041_p13 = pnand %p4039_p0, %p4025_p9  ;;  %p4047_p2 = scmp.lt.s32.totalorder %s4045_s7, %s4038_s16 }
  0xda   : > { %p4042_p1 = pneg %p4041_p13  ;;  %p4048_p5 = por %p4047_p2, %p4046_p11 }
  0xdc   : > { %p4049_p6 = pnand %p4048_p5, %p4042_p1 }
  0xde   : > { %4052 = shalt.err (!%p4049_p6)
}
  0xdf   : > { %3677 = dma.hbm_to_vmem [thread:$0]  (!%p4634_p7), %s4626_s13, 256, %s4628_s12, %s4453_s24, %s5916_s17, %s5916_s17, %s5915_s18  }
  0xe0   : > { %s5931_s25 = sld [smem:[#allocation26_spill]] }
  0xe6   : > { %p5932_p9 = scmp.ne.s32.totalorder %s5931_s25, 0 }
  0xe8   : > { %381 = sbr.rel (%p5932_p9) target bundleno = 928 (0x3a0), region = 48 }
  0xef   : > { %s4670_s10 = sand.u32 1, %s4187_s8  }
  0xf0   : > { %s2818_s5 = sshll.u32 %s4670_s10, 7  ;;  %s384_s20 = scalar_lea.sflag [#allocation4], %s4670_s10 }
  0xf1   : > { %s4676_s3 = scalar_lea.vmem [#allocation3], %s2818_s5 }
  0xf2   : > { %4138 = dma.done.wait (%p4537_p3), %s384_s20, 2048  }
  0xf3   : > { %4140 = vsyncadd (%p4537_p3), %s384_s20, 4294965248  ;;  %s5933_s12 = sld [smem:[#allocation21_spill]]  ;;  %s5934_s13 = sld [smem:[#allocation30_spill]] }
  0xf4   : > { %s392_s24 = sand.u32 1, %s4339_s15  }
  0xf5   : > { %s393_s1 = scalar_lea.sflag [#allocation7], %s392_s24 }
  0xf9   : > { %s394_s18 = sand.u32 1, %s5933_s12   ;;  %p5935_p11 = scmp.ne.s32.totalorder %s5934_s13, 0 }
  0xfa   : > { %s4684_s17 = sshll.u32 %s394_s18, 4 }
  0xfb   : > { %s396_s19 = scalar_lea.vmem [#allocation6], %s4684_s17 }
  0xfc   : > { %4142 = dma.done.wait (%p5935_p11), %s393_s1, 256  }
  0xfd   : > { %4144 = vsyncadd (%p5935_p11), %s393_s1, 4294967040  ;;  %s5936_s0 = sld [smem:[#allocation19_spill]]  ;;  %p5937_p3 = scmp.ne.s32.totalorder %s5926_s21, 0 }
 0x103   : > { %s403_s4 = sand.u32 1, %s5936_s0  }
 0x104   : > { %s4692_s28 = sshll.u32 %s403_s4, 4 }
 0x105   : > { %s405_s16 = scalar_lea.vmem [#allocation8], %s4692_s28 }
 0x106   : > { %4146 = dma.done.wait (%p5937_p3), %s393_s1, 256  }
 0x107   : > { %4148 = vsyncadd (%p5937_p3), %s393_s1, 4294967040  ;;  %p5938_p7 = scmp.eq.s32.totalorder %s4339_s15, 0 }
 0x109   : > { %4150 = dma.done.wait (%p5938_p7), [#allocation10], 10240   ;;  %p5939_p4 = pmov %p5938_p7 }
 0x10a   : > { %v4222_v0 = vmov 0.0   ;;  %vm4223_vm0 = vmmov 0   ;;  %v3827_v1 = vld [vmem:[#allocation9] sm:$0xff]   ;;  %v4706_v2 = vld [vmem:[#allocation9 + $0x8] sm:$0xff]   ;;  %v4710_v3 = vld [vmem:[#allocation9 + $0x10] sm:$0xff]   ;;  %v590_v45 = vlaneseq  ;;  %s5940_s15 = sld [smem:[#allocation22_spill]] }
 0x10b   : > { %4152 = vsyncadd (%p5939_p4), [#allocation10], 4294957056  ;;  %3397 = vmatprep.subr.bf16.mxu1 %v4222_v0  ;;  %3413 = vmatprep.mubr.msk.bf16.mxu1 %vm4223_vm0, %v4222_v0  ;;  %v4716_v4 = vld [vmem:[#allocation9 + $0x18] sm:$0xff]   ;;  %v721_v5 = vld [vmem:[%s4676_s3] sm:$0xff]  ;;  %s5941_s7 = sld [smem:[#allocation44_spill]]  ;;  %vm4224_vm7 = vmmov 1  }
 0x10c   : > { %3437 = vmatprep.subr.bf16.mxu0 %v3827_v1  ;;  %3398 = vmatpush3.bf16.msra.mxu1 %v3827_v1  ;;  %v722_v6 = vld [vmem:[%s4676_s3 + $0x8] sm:$0xff]  ;;  %v4723_v8 = vld [vmem:[#allocation9 + $0x20] sm:$0xff]   ;;  %v4732_v10 = vld [vmem:[#allocation9 + $0x30] sm:$0xff]   ;;  %v4789_v47 = vshrl.u32 %v590_v45, 7  ;;  %s6052_s13 = sld [smem:[#allocation46_spill]]  ;;  %s5669_s24 = scalar_lea.vmem [#allocation12], %s2818_s5 }
 0x10d   : > { %3438 = vmatpush3.bf16.msra.mxu0 %v3827_v1  ;;  %3399 = vmatprep.subr.bf16.mxu1 %v4222_v0  ;;  %v737_v7 = vpack.c.bf16 %v722_v6, %v721_v5  ;;  %v4730_v9 = vld [vmem:[#allocation9 + $0x28] sm:$0xff]   ;;  %v4738_v11 = vld [vmem:[#allocation9 + $0x38] sm:$0xff]   ;;  %v482_v12 = vld [vmem:[%s396_s19] sm:$0xff]  ;;  %s6053_s5 = sld [smem:[#allocation23_spill]]  ;;  %p6055_p0 = scmp.ne.s32.totalorder %s5908_s2, 0 }
 0x10e   : > { %3439 = vmatprep.subr.bf16.mxu0 %v4706_v2  ;;  %v483_v13 = vld [vmem:[%s396_s19 + $0x8] sm:$0xff]  ;;  %v723_v14 = vld [vmem:[%s4676_s3 + $0x10] sm:$0xff]  ;;  %v725_v16 = vld [vmem:[%s4676_s3 + $0x20] sm:$0xff]  ;;  %v4792_v51 = vadd.s32 8, %v4789_v47  ;;  %v4796_v57 = vadd.s32 24, %v4789_v47  ;;  %v4800_v61 = vadd.s32 40, %v4789_v47 }
 0x10f   : > { %3453 = vmatprep.mubr.bf16.mxu0 %v737_v7  ;;  %v724_v15 = vld [vmem:[%s4676_s3 + $0x18] sm:$0xff]  ;;  %v726_v17 = vld [vmem:[%s4676_s3 + $0x28] sm:$0xff]  ;;  %v3835_v18 = vld [vmem:[#allocation11 + $0x140] sm:$0xff]   ;;  %v484_v19 = vpack.c.bf16 %v483_v13, %v482_v12  ;;  %v4808_v6 = vadd.s32 72, %v4789_v47  ;;  %vm5864_vm1 = vcmp.lt.s32.totalorder %v4789_v47, 7  ;;  %vm5865_vm2 = vcmp.lt.s32.totalorder %v4789_v47, 1 }
 0x110   : > { %3400 = vmatpush3.bf16.msra.mxu1 %v4706_v2  ;;  %v738_v20 = vpack.c.bf16 %v724_v15, %v723_v14  ;;  %v739_v21 = vpack.c.bf16 %v726_v17, %v725_v16  ;;  %v3836_v22 = vld [vmem:[#allocation11 + $0x148] sm:$0xff]   ;;  %v727_v23 = vld [vmem:[%s4676_s3 + $0x30] sm:$0xff]  ;;  %v728_v24 = vld [vmem:[%s4676_s3 + $0x38] sm:$0xff]  ;;  %v604_v53 = vand.u32 15, %v4792_v51  ;;  %v899_v60 = vand.u32 15, %v4796_v57  ;;  %p584_p10 = scmp.eq.s32.totalorder %s5940_s15, 0 }
 0x111   : > { %3440 = vmatpush3.bf16.msra.mxu0 %v4706_v2  ;;  %3401 = vmatprep.subr.bf16.mxu1 %v4222_v0  ;;  %v729_v25 = vld [vmem:[%s4676_s3 + $0x40] sm:$0xff]  ;;  %v730_v26 = vld [vmem:[%s4676_s3 + $0x48] sm:$0xff]  ;;  %v3837_v27 = vld [vmem:[#allocation11 + $0x150] sm:$0xff]   ;;  %v740_v28 = vpack.c.bf16 %v728_v24, %v727_v23  ;;  %v913_v63 = vand.u32 15, %v4800_v61  ;;  %v941_v7 = vand.u32 15, %v4808_v6  ;;  %v597_v14 = vand.u32 15, %v4789_v47 }
 0x112   : > { %3441 = vmatprep.subr.bf16.mxu0 %v4710_v3  ;;  %v741_v29 = vpack.c.bf16 %v730_v26, %v729_v25  ;;  %v731_v30 = vld [vmem:[%s4676_s3 + $0x50] sm:$0xff]  ;;  %v732_v31 = vld [vmem:[%s4676_s3 + $0x58] sm:$0xff]  ;;  %v733_v32 = vld [vmem:[%s4676_s3 + $0x60] sm:$0xff]  ;;  %v4817_v15 = vadd.s32 104, %v4789_v47  ;;  %v4821_v17 = vadd.s32 120, %v4789_v47  ;;  %v4833_v24 = vadd.s32 48, %v4789_v47 }
 0x113   : > { %v734_v33 = vld [vmem:[%s4676_s3 + $0x68] sm:$0xff]  ;;  %v742_v34 = vpack.c.bf16 %v732_v31, %v731_v30  ;;  %v735_v36 = vld [vmem:[%s4676_s3 + $0x70] sm:$0xff]  ;;  %v736_v37 = vld [vmem:[%s4676_s3 + $0x78] sm:$0xff]  ;;  %v4837_v26 = vadd.s32 64, %v4789_v47  ;;  %v4845_v30 = vadd.s32 96, %v4789_v47  ;;  %vm4876_vm4 = vcmp.ne.s32.totalorder %v604_v53, 15 }
 0x114   : > { %3402 = vmatpush3.bf16.msra.mxu1 %v4710_v3  ;;  %v743_v35 = vpack.c.bf16 %v734_v33, %v733_v32  ;;  %v744_v38 = vpack.c.bf16 %v736_v37, %v735_v36  ;;  %v649_v39 = vld [vmem:[%s405_s16] sm:$0xff]  ;;  %v650_v40 = vld [vmem:[%s405_s16 + $0x8] sm:$0xff]  ;;  %v969_v16 = vand.u32 15, %v4817_v15  ;;  %v4849_v32 = vadd.s32 112, %v4789_v47  ;;  %s585_s21 = scalar_select %p584_p10, 1, 0  ;;  %vm4950_vm8 = vmpackc.low %vm4876_vm4, %vm4224_vm7 }
 0x115   : > { %3442 = vmatpush3.bf16.msra.mxu0 %v4710_v3  ;;  %3403 = vmatprep.subr.bf16.mxu1 %v4222_v0  ;;  %v651_v41 = vpack.c.bf16 %v650_v40, %v649_v39  ;;  %v3838_v42 = vld [vmem:[#allocation11 + $0x158] sm:$0xff]   ;;  %v3839_v43 = vld [vmem:[#allocation11 + $0x160] sm:$0xff]   ;;  %v3842_v48 = vld [vmem:[#allocation11 + $0x168] sm:$0xff]   ;;  %vm4895_vm5 = vcmp.ne.s32.totalorder %v899_v60, 15  ;;  %vm4908_vm6 = vcmp.ne.s32.totalorder %v913_v63, 15  ;;  %vm4991_vm10 = vcmp.ne.s32.totalorder %v941_v7, 15 }
 0x116   : > { %3443 = vmatprep.subr.bf16.mxu0 %v4716_v4  ;;  %v3840_v44 = vld [vmem:[#allocation11 + $0x100] sm:$0xff]   ;;  %v3843_v49 = vld [vmem:[#allocation11 + $0x108] sm:$0xff]   ;;  %v3845_v52 = vld [vmem:[#allocation11 + $0x170] sm:$0xff]   ;;  %v586_v37 = vstv %s585_s21  ;;  %v5956_v6 = vmov 0  ;;  %vm5072_vm14 = vcmp.ne.s32.totalorder %v597_v14, 0  ;;  %vm5085_vm15 = vcmp.ne.s32.totalorder %v969_v16, 15 }
 0x117   : > { %v3841_v46 = vld [vmem:[#allocation11 + $0xc0] sm:$0xff]   ;;  %v3844_v50 = vld [vmem:[#allocation11 + $0xc8] sm:$0xff]   ;;  %v3846_v54 = vld [vmem:[#allocation11 + $0x110] sm:$0xff]   ;;  %vm4865_vm3 = vcmp.eq.s32.totalorder %v586_v37, 1  ;;  %v5970_v16 = vmov 0  ;;  %p697_p12 = scmp.eq.s32.totalorder %s5940_s15, 1 }
 0x118   : > { %3404 = vmatpush3.bf16.msra.mxu1 %v4716_v4  ;;  %v3847_v55 = vld [vmem:[#allocation11 + $0xd0] sm:$0xff]   ;;  %v3848_v56 = vld [vmem:[#allocation11 + $0x178] sm:$0xff]   ;;  %v3851_v62 = vld [vmem:[#allocation11 + $0x40] sm:$0xff]   ;;  %s2920_s18 = sshll.u32 %s5940_s15, 4  ;;  %s2909_s17 = sshll.u32 %s6053_s5, 5 }
 0x119   : > { %3444 = vmatpush3.bf16.msra.mxu0 %v4716_v4  ;;  %3405 = vmatprep.subr.bf16.mxu1 %v4222_v0  ;;  %v3849_v58 = vld [vmem:[#allocation11 + $0x118] sm:$0xff]   ;;  %vm5005_vm11 = vmpackc.low %vm4895_vm5, %vm4224_vm7  ;;  %v3852_v7 = vld [vmem:[#allocation11] sm:$0xff]   ;;  %s5239_s25 = scalar_select %p697_p12, 1, 0 }
 0x11a   : > { %3445 = vmatprep.subr.bf16.mxu0 %v4723_v8  ;;  %v3850_v59 = vld [vmem:[#allocation11 + $0xd8] sm:$0xff]   ;;  %v5957_v6 = vsel %vm5005_vm11, 4294967295, %v5956_v6  ;;  %vm5022_vm12 = vmpackc.low %vm4908_vm6, %vm4224_vm7  ;;  %s2628_s1 = sadd.s32 %s2920_s18, %s2909_s17  ;;  %s2631_s19 = sshll.u32 %s5669_s24, 4  ;;  %s5721_s19 = int_to_ptr.vmem [resolvable:$true] %s2631_s19 }
 0x11b   : > { %v3866_v12 = vld [vmem:[#allocation11 + $0xf8] sm:$0xff]   ;;  %5958 = vst [vmem:[#allocation32_spill] sm:$0xff] %v5957_v6  ;;  %vm5120_vm4 = vmpackc.low %vm4991_vm10, %vm4224_vm7  ;;  %v5992_v6 = vmov 0  ;;  %s2910_s0 = sshll.u32 %s2628_s1, 7  ;;  %s6054_s16 = sld [smem:[#allocation47_spill]] }
 0x11c   : > { %3406 = vmatpush3.bf16.msra.mxu1 %v4723_v8  ;;  %vm5231_vm10 = vmpackc.low %vm5085_vm15, %vm4224_vm7  ;;  %s4053_s21 = scalar_lea.vmem %s5721_s19, 2048  ;;  %s4225_s11 = smov [#allocation12]  }
 0x11d   : > { %3446 = vmatpush3.bf16.msra.mxu0 %v4723_v8  ;;  %3407 = vmatprep.subr.bf16.mxu1 %v4222_v0  ;;  %p4054_p8 = scmp.ne.s32.totalorder %s5721_s19, %s4053_s21  ;;  %s4057_s23 = sshll.u32 %s4225_s11, 4  ;;  %s4058_s23 = int_to_ptr.vmem [resolvable:$false] %s4057_s23 }
 0x11e   : > { %3447 = vmatprep.subr.bf16.mxu0 %v4730_v9  ;;  %p4060_p2 = scmp.lt.s32.totalorder %s5721_s19, %s4058_s23 }
 0x11f   : > { %p4055_p13 = pnand %p4054_p8, %p6055_p0 }
 0x120   : > { %3408 = vmatpush3.bf16.msra.mxu1 %v4730_v9 }
 0x121   : > { %3448 = vmatpush3.bf16.msra.mxu0 %v4730_v9  ;;  %3409 = vmatprep.subr.bf16.mxu1 %v4222_v0  ;;  %s5727_s15 = scalar_lea.hbm %s6054_s16, %s2910_s0  ;;  %p4056_p1 = pneg %p4055_p13 }
 0x122   : > { %3449 = vmatprep.subr.bf16.mxu0 %v4732_v10 }
 0x124   : > { %3410 = vmatpush3.bf16.msra.mxu1 %v4732_v10 }
 0x125   : > { %3450 = vmatpush3.bf16.msra.mxu0 %v4732_v10  ;;  %3411 = vmatprep.subr.bf16.mxu1 %v4222_v0 }
 0x126   : > { %3451 = vmatprep.subr.bf16.mxu0 %v4738_v11 }
 0x128   : > { %3412 = vmatpush3.bf16.msra.mxu1 %v4738_v11 }
 0x129   : > { %3452 = vmatpush3.bf16.msra.mxu0 %v4738_v11  ;;  %3417 = vmatprep.subr.bf16.mxu1 %v4222_v0 }
 0x12a   : > { %3469 = vmatprep.subr.bf16.mxu0 %v3835_v18 }
 0x12b   : > { %3414 = vmatmul.mubr.bf16.vlgmr.msra.gmra.mrb[0].mxu1 %v484_v19  ;;  %v4825_v19 = vadd.s32 16, %v4789_v47 }
 0x12c   : > { %3454 = vmatmul.mubr.bf16.vlgmr.msra.gmra.mrb[0].mxu0 %v738_v20  ;;  %3418 = vmatpush3.bf16.msra.mxu1 %v3827_v1  ;;  %v3854_v1 = vld [vmem:[#allocation11 + $0xe0] sm:$0xff]   ;;  %v3855_v20 = vld [vmem:[#allocation11 + $0x48] sm:$0xff]  }
 0x12d   : > { %3457 = vmatprep.mubr.bf16.mxu0 %v739_v21  ;;  %3419 = vmatprep.subr.bf16.mxu1 %v4222_v0  ;;  %v3874_v21 = vld [vmem:[#allocation11 + $0x1c0] sm:$0xff]  }
 0x12e   : > { %3433 = vmatprep.mubr.msk.bf16.mxu1 %vm4223_vm0, %v4222_v0  ;;  %3470 = vmatpush3.bf16.msra.mxu0 %v3835_v18 }
 0x12f   : > { %3471 = vmatprep.subr.bf16.mxu0 %v3836_v22 }
 0x130   : > { %3420 = vmatpush3.bf16.msra.mxu1 %v4706_v2  ;;  %v4804_v2 = vadd.s32 56, %v4789_v47 }
 0x131   : > { %3421 = vmatprep.subr.bf16.mxu1 %v4222_v0 }
 0x132   : > { %3472 = vmatpush3.bf16.msra.mxu0 %v3836_v22  ;;  %v927_v5 = vand.u32 15, %v4804_v2  ;;  %v4829_v22 = vadd.s32 32, %v4789_v47 }
 0x133   : > { %3473 = vmatprep.subr.bf16.mxu0 %v3837_v27 }
 0x134   : > { %3458 = vmatmul.mubr.bf16.gmra.mrb[4].mxu0 %v740_v28  ;;  %3422 = vmatpush3.bf16.msra.mxu1 %v4710_v3  ;;  %v3857_v3 = vld [vmem:[#allocation11 + $0x128] sm:$0xff]   ;;  %v4841_v28 = vadd.s32 80, %v4789_v47  ;;  %vm4973_vm9 = vcmp.ne.s32.totalorder %v927_v5, 15 }
 0x135   : > { %3461 = vmatprep.mubr.bf16.mxu0 %v741_v29  ;;  %3423 = vmatprep.subr.bf16.mxu1 %v4222_v0  ;;  %vm5103_vm0 = vmpackc.low %vm4973_vm9, %vm4224_vm7 }
 0x136   : > { %3474 = vmatpush3.bf16.msra.mxu0 %v3837_v27  ;;  %v5971_v16 = vsel %vm5103_vm0, 4294967295, %v5970_v16  ;;  %vm5211_vm9 = vmpackc.low %vm4224_vm7, %vm5072_vm14 }
 0x137   : > { %3475 = vmatprep.subr.bf16.mxu0 %v3838_v42  ;;  %5972 = vst [vmem:[#allocation36_spill] sm:$0xff] %v5971_v16  ;;  %v5993_v6 = vsel %vm5211_vm9, 4294967295, %v5992_v6  ;;  %vm2985_vm14 = vmneg %vm4865_vm3 }
 0x138   : > { %3424 = vmatpush3.bf16.msra.mxu1 %v4716_v4  ;;  %v3858_v4 = vld [vmem:[#allocation11 + $0xe8] sm:$0xff]  }
 0x139   : > { %3425 = vmatprep.subr.bf16.mxu1 %v4222_v0 }
 0x13a   : > { %3476 = vmatpush3.bf16.msra.mxu0 %v3838_v42 }
 0x13b   : > { %3477 = vmatprep.subr.bf16.mxu0 %v3839_v43 }
 0x13c   : > { %3462 = vmatmul.mubr.bf16.gmra.mrb[8].mxu0 %v742_v34  ;;  %3426 = vmatpush3.bf16.msra.mxu1 %v4723_v8  ;;  %v3861_v8 = vld [vmem:[#allocation11 + $0x130] sm:$0xff]   ;;  %v4856_v34 = vld [vmem:[%s5941_s7] ss:$0 sm:$0xff]  ;;  %s4059_s7 = scalar_lea.vmem %s4058_s23, 4096 }
 0x13d   : > { %3465 = vmatprep.mubr.bf16.mxu0 %v743_v35  ;;  %3427 = vmatprep.subr.bf16.mxu1 %v4222_v0  ;;  %p4061_p5 = scmp.lt.s32.totalorder %s4059_s7, %s4053_s21 }
 0x13e   : > { %3478 = vmatpush3.bf16.msra.mxu0 %v3839_v43 }
 0x13f   : > { %3479 = vmatprep.subr.bf16.mxu0 %v3842_v48  ;;  %p4062_p6 = por %p4061_p5, %p4060_p2 }
 0x140   : > { %3428 = vmatpush3.bf16.msra.mxu1 %v4730_v9  ;;  %v3862_v9 = vld [vmem:[#allocation11 + $0xf0] sm:$0xff]  }
 0x141   : > { %3429 = vmatprep.subr.bf16.mxu1 %v4222_v0  ;;  %p4063_p9 = pnand %p4062_p6, %p4056_p1 }
 0x142   : > { %3480 = vmatpush3.bf16.msra.mxu0 %v3842_v48 }
 0x143   : > { %3481 = vmatprep.subr.bf16.mxu0 %v3845_v52 }
 0x144   : > { %3466 = vmatmul.mubr.bf16.gmra.mrb[12].mxu0 %v744_v38  ;;  %3430 = vmatpush3.bf16.msra.mxu1 %v4732_v10  ;;  %v4812_v10 = vadd.s32 88, %v4789_v47 }
 0x145   : > { %3431 = vmatprep.subr.bf16.mxu1 %v4222_v0  ;;  %v3853_v0 = vld [vmem:[#allocation11 + $0x120] sm:$0xff]  }
 0x146   : > { %3482 = vmatpush3.bf16.msra.mxu0 %v3845_v52  ;;  %v955_v13 = vand.u32 15, %v4812_v10 }
 0x147   : > { %3483 = vmatprep.subr.bf16.mxu0 %v3848_v56 }
 0x148   : > { %3432 = vmatpush3.bf16.msra.mxu1 %v4738_v11  ;;  %v3865_v11 = vld [vmem:[#allocation11 + $0x138] sm:$0xff]   ;;  %vm5060_vm13 = vcmp.ne.s32.totalorder %v955_v13, 15 }
 0x149   : > { %3157 = vmatprep.subr.bf16.mxu1 %v3840_v44  ;;  %vm5192_vm6 = vmpackc.low %vm5060_vm13, %vm4224_vm7 }
 0x14a   : > { %3484 = vmatpush3.bf16.msra.mxu0 %v3848_v56 }
 0x14b   : > { %3434 = vmatmul.mubr.bf16.vlgmr.msra.gmra.mrb[4].mxu1 %v651_v41  ;;  %3237 = vmatprep.subr.bf16.mxu0 %v3851_v62 }
 0x14c   : > { %3158 = vmatpush3.bf16.msra.mxu1 %v3841_v46 }
 0x14d   : > { %3159 = vmatprep.subr.bf16.mxu1 %v3843_v49 }
 0x150   : > { %3160 = vmatpush3.bf16.msra.mxu1 %v3844_v50 }
 0x151   : > { %3161 = vmatprep.subr.bf16.mxu1 %v3846_v54  ;;  %v3875_v54 = vld [vmem:[#allocation11 + $0x38] sm:$0xff]  }
 0x154   : > { %3162 = vmatpush3.bf16.msra.mxu1 %v3847_v55 }
 0x155   : > { %3163 = vmatprep.subr.bf16.mxu1 %v3849_v58 }
 0x158   : > { %3164 = vmatpush3.bf16.msra.mxu1 %v3850_v59 }
 0x159   : > { %3165 = vmatprep.subr.bf16.mxu1 %v3853_v0 }
 0x15c   : > { %3166 = vmatpush3.bf16.msra.mxu1 %v3854_v1 }
 0x15d   : > { %3167 = vmatprep.subr.bf16.mxu1 %v3857_v3 }
 0x160   : > { %3168 = vmatpush3.bf16.msra.mxu1 %v3858_v4 }
 0x161   : > { %3169 = vmatprep.subr.bf16.mxu1 %v3861_v8 }
 0x164   : > { %3170 = vmatpush3.bf16.msra.mxu1 %v3862_v9 }
 0x165   : > { %3171 = vmatprep.subr.bf16.mxu1 %v3865_v11 }
 0x168   : > { %3172 = vmatpush3.bf16.msra.mxu1 %v3866_v12 }
 0x169   : > { %3317 = vmatprep.subr.bf16.mxu1 %v3874_v21 }
 0x1fe   : > { %v573_v35 = vpop.f32.mrb[0].mxu1 }
 0x1ff   : > { %v3455_v36 = vpop.f32.mrb[0].mxu0  ;;  %v574_v38 = vadd.f32 %v4856_v34, %v573_v35  ;;  %v3415_v39 = vpop.f32.mrb[1].mxu1 }
 0x200   : > { %v788_v40 = vadd.f32 %v3455_v36, %v4856_v34  ;;  %v779_v41 = vpop.f32.mrb[1].mxu0  ;;  %v576_v42 = vpop.f32.mrb[2].mxu1 }
 0x201   : > { %v780_v43 = vadd.f32 %v4856_v34, %v779_v41  ;;  %v3456_v44 = vpop.f32.mrb[2].mxu0  ;;  %v580_v45 = vmul.f32 0.1, %v574_v38  ;;  %v577_v46 = vadd.f32 %v4856_v34, %v576_v42  ;;  %v3416_v48 = vpop.f32.mrb[3].mxu1 }
 0x202   : > { %v844_v49 = vmul.f32 0.1, %v788_v40  ;;  %v791_v50 = vadd.f32 %v3456_v44, %v4856_v34  ;;  %v782_v52 = vpop.f32.mrb[3].mxu0 }
 0x203   : > { %v842_v55 = vmul.f32 0.1, %v780_v43  ;;  %v783_v56 = vadd.f32 %v4856_v34, %v782_v52  ;;  %v4870_v58 = vmax.f32 %v574_v38, %v580_v45  ;;  %v581_v59 = vmul.f32 0.1, %v577_v46 }
 0x204   : > { %v4872_v62 = vmax.f32 %v788_v40, %v844_v49  ;;  %v845_v0 = vmul.f32 0.1, %v791_v50 }
 0x205   : > { %v4880_v3 = vmax.f32 %v780_v43, %v842_v55  ;;  %v843_v4 = vmul.f32 0.1, %v783_v56  ;;  %v4885_v8 = vsel %vm4865_vm3, 0.0, %v4870_v58  ;;  %v4887_v9 = vmax.f32 %v577_v46, %v581_v59 }
 0x206   : > { %v1058_v11 = vrot.slane %v4872_v62, 7  ;;  %v1148_v12 = vrot.slane %v4872_v62, 1  ;;  %v4891_v21 = vmax.f32 %v791_v50, %v845_v0  ;;  %v617_v38 = vrot.slane %v4885_v8, 7 }
 0x207   : > { %v5844_v53 = vrot.slane %v4880_v3, 7  ;;  %v5843_v35 = vrot.slane %v4880_v3, 1  ;;  %v4901_v36 = vmax.f32 %v783_v56, %v843_v4  ;;  %v3459_v37 = vpop.f32.mrb[4].mxu0  ;;  %v4916_v42 = vsel %vm4865_vm3, 0.0, %v4887_v9 }
 0x208   : > { %v1149_v39 = vrot.slane %v4891_v21, 1  ;;  %v804_v40 = vadd.f32 %v3459_v37, %v4856_v34  ;;  %v795_v41 = vpop.f32.mrb[5].mxu0  ;;  %v618_v52 = vrot.slane %v4916_v42, 7  ;;  %v5846_v33 = vrot.slane %v4891_v21, 7 }
 0x209   : > { %v1057_v43 = vrot.slane %v4901_v36, 7  ;;  %v1147_v44 = vrot.slane %v4901_v36, 1  ;;  %v796_v45 = vadd.f32 %v4856_v34, %v795_v41  ;;  %v3460_v46 = vpop.f32.mrb[6].mxu0  ;;  %v4923_v61 = vpack.c.bf16 %v4901_v36, %v4880_v3 }
 0x20a   : > { %v1174_v63 = vsel %vm5864_vm1, %v1148_v12, %v1149_v39  ;;  %v848_v48 = vmul.f32 0.1, %v804_v40  ;;  %v807_v49 = vadd.f32 %v3460_v46, %v4856_v34  ;;  %v798_v50 = vpop.f32.mrb[7].mxu0 }
 0x20b   : > { %v4935_v55 = vsel %vm5865_vm2, %v5844_v53, %v1057_v43  ;;  %v846_v56 = vmul.f32 0.1, %v796_v45  ;;  %v799_v59 = vadd.f32 %v4856_v34, %v798_v50  ;;  %1584 = vmatprep.mubr.bf16.mxu1 %v4923_v61  ;;  %v1175_v0 = vsel %vm5864_vm1, %v1147_v44, %v1148_v12 }
 0x20c   : > { %v4941_v4 = vmax.f32 %v804_v40, %v848_v48  ;;  %v849_v37 = vmul.f32 0.1, %v807_v49  ;;  %v1176_v41 = vsel %vm5864_vm1, %v5843_v35, %v1147_v44  ;;  %v4956_v50 = vsel %vm5865_vm2, %v617_v38, %v618_v52 }
 0x20d   : > { %v4958_v12 = vmax.f32 %v796_v45, %v846_v56  ;;  %v847_v40 = vmul.f32 0.1, %v799_v59  ;;  %v4960_v48 = vpack.c.bf16 %v1175_v0, %v1176_v41  ;;  %v4964_v44 = vsel %vm5865_vm2, %v618_v52, %v617_v38 }
 0x20e   : > { %v1152_v31 = vrot.slane %v4941_v4, 1  ;;  %v4969_v29 = vmax.f32 %v807_v49, %v849_v37 }
 0x20f   : > { %v1150_v56 = vrot.slane %v4958_v12, 1  ;;  %v4978_v0 = vmax.f32 %v799_v59, %v847_v40  ;;  %3485 = vmatprep.mubr.msk.bf16.mxu0 %vm4950_vm8, %v4960_v48  ;;  %v3463_v38 = vpop.f32.mrb[8].mxu0  ;;  %v5847_v2 = vrot.slane %v4958_v12, 7 }
 0x210   : > { %v1153_v5 = vrot.slane %v4969_v29, 1  ;;  %v820_v37 = vadd.f32 %v3463_v38, %v4856_v34  ;;  %v811_v41 = vpop.f32.mrb[9].mxu0  ;;  %v5143_v16 = vpack.c.bf16 %v4969_v29, %v4941_v4 }
 0x211   : > { %v1173_v27 = vsel %vm5864_vm1, %v1149_v39, %v1150_v56  ;;  %v5845_v25 = vrot.slane %v4978_v0, 7  ;;  %v1151_v23 = vrot.slane %v4978_v0, 1  ;;  %v812_v49 = vadd.f32 %v4856_v34, %v811_v41  ;;  %v3464_v38 = vpop.f32.mrb[10].mxu0 }
 0x212   : > { %v5009_v60 = vpack.c.bf16 %v1173_v27, %v1174_v63  ;;  %v852_v40 = vmul.f32 0.1, %v820_v37  ;;  %v823_v39 = vadd.f32 %v3464_v38, %v4856_v34  ;;  %v814_v52 = vpop.f32.mrb[11].mxu0  ;;  %v1170_v35 = vsel %vm5864_vm1, %v1152_v31, %v1153_v5 }
 0x213   : > { %v850_v41 = vmul.f32 0.1, %v812_v49  ;;  %v815_v53 = vadd.f32 %v4856_v34, %v814_v52  ;;  %v1171_v51 = vsel %vm5864_vm1, %v1151_v23, %v1152_v31  ;;  %v1172_v1 = vsel %vm5864_vm1, %v1150_v56, %v1151_v23  ;;  %v3856_v56 = vld [vmem:[#allocation11 + $0x8] sm:$0xff]  }
 0x214   : > { %5959 = vst [vmem:[#allocation33_spill] sm:$0xff] %v5009_v60  ;;  %v5960_v27 = vmov 0  ;;  %v5026_v63 = vmax.f32 %v820_v37, %v852_v40  ;;  %v853_v38 = vmul.f32 0.1, %v823_v39  ;;  %3486 = vmatmul.mubr.msk.bf16.vlgmr.msra.gmra.mrb[16].mxu0 %vm5005_vm11, %v5009_v60  ;;  %v5031_v52 = vpack.c.bf16 %v1171_v51, %v1172_v1 }
 0x215   : > { %v5961_v27 = vsel %vm5022_vm12, 4294967295, %v5960_v27  ;;  %v5035_v31 = vpack.c.bf16 %v4891_v21, %v4872_v62  ;;  %v5037_v23 = vmax.f32 %v812_v49, %v850_v41  ;;  %v851_v57 = vmul.f32 0.1, %v815_v53  ;;  %3238 = vmatpush3.bf16.msra.mxu0 %v3852_v7  ;;  %v3859_v41 = vld [vmem:[#allocation11 + $0x50] sm:$0xff]  }
 0x216   : > { %5962 = vst [vmem:[#allocation34_spill] sm:$0xff] %v5961_v27  ;;  %5963 = vst [vmem:[#allocation35_spill] sm:$0xff] %v5031_v52  ;;  %v1084_v37 = vsel %vm5865_vm2, %v1058_v11, %v5846_v33  ;;  %v1085_v1 = vsel %vm5865_vm2, %v1057_v43, %v1058_v11  ;;  %v5053_v7 = vmax.f32 %v823_v39, %v853_v38  ;;  %3489 = vmatprep.mubr.msk.bf16.mxu0 %vm5022_vm12, %v5031_v52  ;;  %v3860_v49 = vld [vmem:[#allocation11 + $0x10] sm:$0xff]  }
 0x217   : > { %3239 = vmatprep.subr.bf16.mxu0 %v3855_v20  ;;  %v5064_v36 = vpack.c.bf16 %v1084_v37, %v1085_v1  ;;  %v1156_v11 = vrot.slane %v5026_v63, 1  ;;  %v1154_v43 = vrot.slane %v5037_v23, 1  ;;  %v5068_v39 = vmax.f32 %v815_v53, %v851_v57  ;;  %v3467_v51 = vpop.f32.mrb[12].mxu0 }
 0x218   : > { %v5078_v10 = vpack.c.bf16 %v4978_v0, %v4958_v12  ;;  %v1157_v38 = vrot.slane %v5053_v7, 1  ;;  %v836_v37 = vadd.f32 %v3467_v51, %v4856_v34  ;;  %v827_v1 = vpop.f32.mrb[13].mxu0  ;;  %v1082_v14 = vsel %vm5865_vm2, %v5847_v2, %v5845_v25 }
 0x219   : > { %v1155_v40 = vrot.slane %v5068_v39, 1  ;;  %v828_v51 = vadd.f32 %v4856_v34, %v827_v1  ;;  %3240 = vmatpush3.bf16.msra.mxu0 %v3856_v56  ;;  %v3468_v13 = vpop.f32.mrb[14].mxu0  ;;  %v1169_v15 = vsel %vm5864_vm1, %v1153_v5, %v1154_v43  ;;  %v3863_v56 = vld [vmem:[#allocation11 + $0x58] sm:$0xff]   ;;  %v5991_v52 = vrot.slane %v4880_v3, 7 }
 0x21a   : > { %v856_v25 = vmul.f32 0.1, %v836_v37  ;;  %v839_v57 = vadd.f32 %v3468_v13, %v4856_v34  ;;  %v830_v18 = vpop.f32.mrb[15].mxu0  ;;  %3241 = vmatprep.subr.bf16.mxu0 %v3859_v41  ;;  %v5108_v33 = vpack.c.bf16 %v1169_v15, %v1170_v35  ;;  %v1166_v1 = vsel %vm5864_vm1, %v1156_v11, %v1157_v38 }
 0x21b   : > { %v854_v5 = vmul.f32 0.1, %v828_v51  ;;  %v831_v2 = vadd.f32 %v4856_v34, %v830_v18  ;;  %v1167_v45 = vsel %vm5864_vm1, %v1155_v40, %v1156_v11  ;;  %v1168_v27 = vsel %vm5864_vm1, %v1154_v43, %v1155_v40 }
 0x21c   : > { %5973 = vst [vmem:[#allocation37_spill] sm:$0xff] %v5108_v33  ;;  %v5974_v41 = vmov 0  ;;  %v5124_v35 = vmax.f32 %v836_v37, %v856_v25  ;;  %v857_v13 = vmul.f32 0.1, %v839_v57  ;;  %3490 = vmatmul.mubr.msk.bf16.gmra.mrb[20].mxu0 %vm5103_vm0, %v5108_v33  ;;  %v5129_v18 = vpack.c.bf16 %v1167_v45, %v1168_v27  ;;  %v3864_v25 = vld [vmem:[#allocation11 + $0x18] sm:$0xff]  }
 0x21d   : > { %v5975_v41 = vsel %vm5120_vm4, 4294967295, %v5974_v41  ;;  %v5978_v11 = vrot.slane %v4958_v12, 7  ;;  %v5979_v40 = vrot.slane %v4891_v21, 7  ;;  %v5137_v43 = vmax.f32 %v828_v51, %v854_v5  ;;  %3242 = vmatpush3.bf16.msra.mxu0 %v3860_v49  ;;  %v3867_v49 = vld [vmem:[#allocation11 + $0x60] sm:$0xff]  }
 0x21e   : > { %5976 = vst [vmem:[#allocation38_spill] sm:$0xff] %v5975_v41  ;;  %5977 = vst [vmem:[#allocation39_spill] sm:$0xff] %v5129_v18  ;;  %v855_v15 = vmul.f32 0.1, %v831_v2  ;;  %v1067_v27 = vrot.slane %v5053_v7, 7  ;;  %v1160_v12 = vrot.slane %v5124_v35, 1  ;;  %v5147_v21 = vmax.f32 %v839_v57, %v857_v13  ;;  %3493 = vmatprep.mubr.msk.bf16.mxu0 %vm5120_vm4, %v5129_v18  ;;  %3243 = vmatprep.subr.bf16.mxu0 %v3863_v56 }
 0x21f   : > { %v1083_v59 = vsel %vm5865_vm2, %v5979_v40, %v5978_v11  ;;  %v5980_v51 = vand.u32 15, %v4821_v17  ;;  %v5983_v5 = vrot.slane %v4969_v29, 7  ;;  %v5984_v45 = vrot.slane %v4941_v4, 7  ;;  %v5164_v13 = vpop.f32.mrb[4].mxu1 }
 0x220   : > { %v5139_v37 = vpack.c.bf16 %v1082_v14, %v1083_v59  ;;  %v1068_v11 = vrot.slane %v5137_v43, 7  ;;  %v1158_v56 = vrot.slane %v5137_v43, 1  ;;  %v5168_v40 = vmax.f32 %v831_v2, %v855_v15  ;;  %v3435_v41 = vpop.f32.mrb[5].mxu1 }
 0x221   : > { %vm5154_vm5 = vcmp.ne.s32.totalorder %v5980_v51, 15  ;;  %v1080_v57 = vsel %vm5865_vm2, %v5984_v45, %v5983_v5  ;;  %v5985_v17 = vmov %v5984_v45  ;;  %v5986_v59 = vrot.slane %v4978_v0, 7  ;;  %v689_v2 = vpop.f32.mrb[6].mxu1  ;;  %3244 = vmatpush3.bf16.msra.mxu0 %v3864_v25 }
 0x222   : > { %v1071_v18 = vrot.slane %v5147_v21, 7  ;;  %v1161_v5 = vrot.slane %v5147_v21, 1  ;;  %v5183_v33 = vpack.c.bf16 %v5068_v39, %v5037_v23  ;;  %v1069_v4 = vrot.slane %v5168_v40, 7  ;;  %v3436_v25 = vpop.f32.mrb[7].mxu1  ;;  %3245 = vmatprep.subr.bf16.mxu0 %v3867_v49  ;;  %vm5326_vm15 = vmpackc.low %vm5154_vm5, %vm4224_vm7 }
 0x223   : > { %v1081_v51 = vsel %vm5865_vm2, %v5986_v59, %v5985_v17  ;;  %v1159_v0 = vrot.slane %v5168_v40, 1  ;;  %v1165_v15 = vsel %vm5864_vm1, %v1157_v38, %v1158_v56  ;;  %v5989_v17 = vrot.slane %v5068_v39, 7  ;;  %vm2987_vm5 = vmpackc.low %vm2985_vm14, %vm2985_vm14 }
 0x224   : > { %v5179_v45 = vpack.c.bf16 %v1080_v57, %v1081_v51  ;;  %v3868_v57 = vld [vmem:[#allocation11 + $0x20] sm:$0xff]   ;;  %v5990_v59 = vrot.slane %v5037_v23, 7  ;;  %v1087_v38 = vsel %vm5865_vm2, %v1071_v18, %v5991_v52  ;;  %v5206_v62 = vpack.c.bf16 %v1165_v15, %v1166_v1 }
 0x225   : > { %v1162_v60 = vsel %vm5864_vm1, %v1160_v12, %v1161_v5  ;;  %v5222_v52 = vpack.c.bf16 %v4935_v55, %v1087_v38  ;;  %v1163_v1 = vsel %vm5864_vm1, %v1159_v0, %v1160_v12  ;;  %v1164_v20 = vsel %vm5864_vm1, %v1158_v56, %v1159_v0  ;;  %v3878_v12 = vld [vmem:[#allocation11 + $0x1c8] sm:$0xff]   ;;  %3246 = vmatpush3.bf16.msra.mxu0 %v3868_v57  ;;  %v3871_v57 = vld [vmem:[#allocation11 + $0x70] sm:$0xff]  }
 0x226   : > { %v1078_v51 = vsel %vm5865_vm2, %v5990_v59, %v5989_v17  ;;  %v5994_v17 = vrot.slane %v4880_v3, 1  ;;  %v3869_v3 = vld [vmem:[#allocation11 + $0x68] sm:$0xff]   ;;  %3494 = vmatmul.mubr.msk.bf16.gmra.mrb[24].mxu0 %vm5192_vm6, %v5206_v62  ;;  %v5244_v55 = vpack.c.bf16 %v1163_v1, %v1164_v20  ;;  %v5997_v53 = vrot.slane %v5037_v23, 7 }
 0x227   : > { %v5998_v56 = vrot.slane %v4969_v29, 7  ;;  %v5999_v25 = vrot.slane %v5026_v63, 7  ;;  %2924 = vmatmul.mubr.msk.bf16.vlgmr.msra.gmra.mrb[8].mxu1 %vm5211_vm9, %v5222_v52  ;;  %v3870_v29 = vld [vmem:[#allocation11 + $0x28] sm:$0xff]   ;;  %v5274_v20 = vpack.c.bf16 %v5168_v40, %v5137_v43  ;;  %v1075_v43 = vsel %vm5865_vm2, %v1067_v27, %v1068_v11  ;;  %3247 = vmatprep.subr.bf16.mxu0 %v3869_v3 }
 0x228   : > { %v1177_v59 = vsel %vm5864_vm1, %v1161_v5, %v5994_v17  ;;  %v3876_v5 = vld [vmem:[#allocation11 + $0x180] sm:$0xff]   ;;  %v1070_v17 = vrot.slane %v5124_v35, 7  ;;  %1592 = vmatprep.mubr.bf16.mxu1 %v5035_v31  ;;  %3497 = vmatprep.mubr.msk.bf16.mxu0 %vm5231_vm10, %v5244_v55  ;;  %v3879_v40 = vld [vmem:[#allocation11 + $0x188] sm:$0xff]   ;;  %v6006_v3 = vrot.slane %v4885_v8, 1  ;;  %vm6021_vm14 = vcmp.lt.s32.totalorder %v4789_v47, 1 }
 0x229   : > { %v5235_v15 = vpack.c.bf16 %v1177_v59, %v1162_v60  ;;  %v1079_v0 = vsel %vm5865_vm2, %v5998_v56, %v5997_v53  ;;  %v5254_v60 = vpack.c.bf16 %v5053_v7, %v5026_v63  ;;  %v1076_v38 = vsel %vm5865_vm2, %v5999_v25, %v1067_v27  ;;  %3318 = vmatpush3.bf16.msra.mxu1 %v3876_v5 }
 0x22a   : > { %v5264_v23 = vpack.c.bf16 %v1078_v51, %v1079_v0  ;;  %v6000_v59 = vmov %v5999_v25  ;;  %v6001_v7 = vrot.slane %v5068_v39, 7  ;;  %v6002_v51 = vand.u32 15, %v4825_v19  ;;  %3319 = vmatprep.subr.bf16.mxu1 %v3878_v12  ;;  %3248 = vmatpush3.bf16.msra.mxu0 %v3870_v29  ;;  %v3873_v29 = vld [vmem:[#allocation11 + $0x78] sm:$0xff]  }
 0x22b   : > { %v1074_v53 = vsel %vm5865_vm2, %v1068_v11, %v1069_v4  ;;  %v5296_v19 = vpack.c.bf16 %v5147_v21, %v5124_v35  ;;  %v1072_v0 = vsel %vm5865_vm2, %v1070_v17, %v1071_v18  ;;  %v699_v25 = vstv %s5239_s25  ;;  %3249 = vmatprep.subr.bf16.mxu0 %v3871_v57 }
 0x22c   : > { %v1077_v1 = vsel %vm5865_vm2, %v6001_v7, %v6000_v59  ;;  %vm5282_vm13 = vcmp.ne.s32.totalorder %v6002_v51, 0  ;;  %v5292_v56 = vpack.c.bf16 %v1074_v53, %v1075_v43  ;;  %v1073_v27 = vsel %vm5865_vm2, %v1069_v4, %v1070_v17  ;;  %v3872_v17 = vld [vmem:[#allocation11 + $0x30] sm:$0xff]   ;;  %v3877_v53 = vld [vmem:[#allocation11 + $0x80] sm:$0xff]  }
 0x22d   : > { %v5286_v39 = vpack.c.bf16 %v1076_v38, %v1077_v1  ;;  %v3881_v38 = vld [vmem:[#allocation11 + $0x1d0] sm:$0xff]   ;;  %v6005_v11 = vrot.slane %v4916_v42, 1  ;;  %v6007_v21 = vmov %v6006_v3  ;;  %v687_v12 = vadd.f32 %v4856_v34, %v5164_v13  ;;  %3320 = vmatpush3.bf16.msra.mxu1 %v3879_v40 }
 0x22e   : > { %v6009_v4 = vmov 0  ;;  %v5330_v59 = vpack.c.bf16 %v1072_v0, %v1073_v27  ;;  %v690_v42 = vadd.f32 %v4856_v34, %v689_v2  ;;  %v3882_v7 = vld [vmem:[#allocation11 + $0x190] sm:$0xff]   ;;  %vm5346_vm2 = vcmp.eq.s32.totalorder %v699_v25, 1  ;;  %3498 = vmatmul.mubr.msk.bf16.gmra.mrb[28].mxu0 %vm5326_vm15, %v5235_v15  ;;  %3321 = vmatprep.subr.bf16.mxu1 %v3881_v38  ;;  %v3884_v2 = vld [vmem:[#allocation11 + $0x1d8] sm:$0xff]  }
 0x22f   : > { %v5311_v35 = vsel %vm5864_vm1, %v6006_v3, %v6005_v11  ;;  %v6008_v18 = vmov %v6005_v11  ;;  %v6010_v4 = vsel %vm5326_vm15, 4294967295, %v6009_v4  ;;  %v693_v14 = vmul.f32 0.1, %v687_v12  ;;  %3250 = vmatpush3.bf16.msra.mxu0 %v3872_v17  ;;  %v3885_v25 = vld [vmem:[#allocation11 + $0x198] sm:$0xff]  }
 0x230   : > { %v5319_v5 = vsel %vm5864_vm1, %v6008_v18, %v6007_v21  ;;  %vm5338_vm1 = vmpackc.low %vm4224_vm7, %vm5282_vm13  ;;  %v6013_v1 = vmov 0  ;;  %v694_v34 = vmul.f32 0.1, %v690_v42  ;;  %v6015_v63 = vpack.c.bf16 %v4887_v9, %v4870_v58  ;;  %3251 = vmatprep.subr.bf16.mxu0 %v3873_v29  ;;  %v3887_v9 = vld [vmem:[#allocation11 + $0x1e0] sm:$0xff]  }
 0x231   : > { %v3024_v8 = vpack.c.bf16 %v5319_v5, %v5311_v35  ;;  %v6014_v1 = vsel %vm5346_vm2, 4294967295, %v6013_v1  ;;  %v5353_v57 = vmax.f32 %v687_v12, %v693_v14  ;;  %2928 = vmatmul.mubr.msk.bf16.gmra.mrb[12].mxu1 %vm5338_vm1, %v5064_v36  ;;  %v6016_v43 = vand.u32 15, %v4829_v22  ;;  %v3880_v14 = vld [vmem:[#allocation11 + $0x88] sm:$0xff]   ;;  %v3888_v29 = vld [vmem:[#allocation11 + $0x1a0] sm:$0xff]  }
 0x232   : > { %v5358_v51 = vmax.f32 %v690_v42, %v694_v34  ;;  %2989 = vmatprep.mubr.msk.bf16.mxu0 %vm2987_vm5, %v6015_v63  ;;  %1600 = vmatprep.mubr.bf16.mxu1 %v5078_v10  ;;  %vm6022_vm5 = vmmov %vm6021_vm14  ;;  %vm6023_vm15 = vcmp.lt.s32.totalorder %v4789_v47, 7  ;;  %v3883_v47 = vld [vmem:[#allocation11 + $0x90] sm:$0xff]   ;;  %v6026_v63 = vand.u32 15, %v4833_v24  ;;  %v3895_v24 = vld [vmem:[#allocation11 + $0x1f8] sm:$0xff]   ;;  %v6029_v40 = vand.u32 15, %v4837_v26 }
 0x233   : > { %vm5366_vm3 = vcmp.ne.s32.totalorder %v6016_v43, 0  ;;  %v701_v0 = vsel %vm5346_vm2, 0.0, %v5353_v57  ;;  %3322 = vmatpush3.bf16.msra.mxu1 %v3882_v7  ;;  %3252 = vmatpush3.bf16.msra.mxu0 %v3875_v54  ;;  %v3890_v54 = vld [vmem:[#allocation11 + $0x1e8] sm:$0xff]   ;;  %v3886_v43 = vld [vmem:[#allocation11 + $0x98] sm:$0xff]   ;;  %v6032_v26 = vand.u32 15, %v4841_v28  ;;  %v6035_v28 = vand.u32 15, %v4845_v30 }
 0x234   : > { %v703_v38 = vrot.slane %v701_v0, 7  ;;  %v709_v27 = vrot.slane %v701_v0, 1  ;;  %v702_v58 = vsel %vm5346_vm2, 0.0, %v5358_v51  ;;  %v3085_v22 = vpack.c.bf16 %v5358_v51, %v5353_v57  ;;  %3323 = vmatprep.subr.bf16.mxu1 %v3884_v2  ;;  %3501 = vmatprep.subr.bf16.mxu0 %v3877_v53  ;;  %vm5381_vm13 = vmpackc.low %vm4224_vm7, %vm5366_vm3  ;;  %v3889_v0 = vld [vmem:[#allocation11 + $0xa0] sm:$0xff]  }
 0x235   : > { %v704_v11 = vrot.slane %v702_v58, 7  ;;  %v710_v3 = vrot.slane %v702_v58, 1  ;;  %vm6024_vm2 = vmmov %vm6023_vm15  ;;  %v6025_v2 = vpack.c.bf16 %v4956_v50, %v4964_v44  ;;  %v3891_v50 = vld [vmem:[#allocation11 + $0x1a8] sm:$0xff]   ;;  %v3893_v44 = vld [vmem:[#allocation11 + $0x1f0] sm:$0xff]   ;;  %vm3691_vm3 = vcmp.ne.s32.totalorder %v6029_v40, 0 }
 0x236   : > { %v6038_v30 = vand.u32 15, %v4849_v32  ;;  %v3900_v32 = vld [vmem:[#allocation11 + $0x208] sm:$0xff]  }
 0x237   : > { %v5387_v18 = vsel %vm6021_vm14, %v703_v38, %v704_v11  ;;  %v5391_v12 = vsel %vm6022_vm5, %v704_v11, %v703_v38  ;;  %v5395_v17 = vsel %vm6023_vm15, %v709_v27, %v710_v3  ;;  %v5399_v42 = vsel %vm6024_vm2, %v710_v3, %v709_v27  ;;  %3324 = vmatpush3.bf16.msra.mxu1 %v3885_v25  ;;  %v3896_v25 = vld [vmem:[#allocation11 + $0x1b8] sm:$0xff]   ;;  %vm5433_vm14 = vmpackc.low %vm4224_vm7, %vm3691_vm3  ;;  %v3892_v38 = vld [vmem:[#allocation11 + $0xa8] sm:$0xff]  }
 0x238   : > { %v3089_v7 = vpack.c.bf16 %v5387_v18, %v5391_v12  ;;  %v3121_v34 = vpack.c.bf16 %v5399_v42, %v5395_v17  ;;  %2993 = vmatmul.mubr.msk.bf16.vlgmr.msra.gmra.mrb[32].mxu0 %vm5211_vm9, %v6025_v2  ;;  %3325 = vmatprep.subr.bf16.mxu1 %v3887_v9  ;;  %vm3690_vm2 = vcmp.ne.s32.totalorder %v6026_v63, 0  ;;  %vm3692_vm5 = vcmp.ne.s32.totalorder %v6032_v26, 0  ;;  %v3897_v27 = vld [vmem:[#allocation11 + $0xb0] sm:$0xff]   ;;  %v3898_v9 = vld [vmem:[#allocation11 + $0xb8] sm:$0xff]   ;;  %v3899_v11 = vld [vmem:[#allocation11 + $0x200] sm:$0xff]  }
 0x239   : > { %3502 = vmatpush3.bf16.msra.mxu0 %v3877_v53  ;;  %2932 = vmatmul.mubr.msk.bf16.gmra.mrb[16].mxu1 %vm5381_vm13, %v5139_v37  ;;  %vm5418_vm15 = vmpackc.low %vm4224_vm7, %vm3690_vm2  ;;  %vm3693_vm3 = vcmp.ne.s32.totalorder %v6035_v28, 0 }
 0x23a   : > { %1930 = vmatprep.mubr.bf16.mxu0 %v4923_v61  ;;  %1608 = vmatprep.mubr.bf16.mxu1 %v5143_v16  ;;  %v3894_v61 = vld [vmem:[#allocation11 + $0x1b0] sm:$0xff]   ;;  %vm5448_vm2 = vmpackc.low %vm4224_vm7, %vm3692_vm5 }
 0x23b   : > { %3503 = vmatprep.subr.bf16.mxu0 %v3880_v14  ;;  %3326 = vmatpush3.bf16.msra.mxu1 %v3888_v29  ;;  %vm5463_vm5 = vmpackc.low %vm4224_vm7, %vm3693_vm3  ;;  %vm3694_vm3 = vcmp.ne.s32.totalorder %v6038_v30, 0 }
 0x23c   : > { %3327 = vmatprep.subr.bf16.mxu1 %v3890_v54 }
 0x23d   : > { %3504 = vmatpush3.bf16.msra.mxu0 %v3880_v14 }
 0x23e   : > { %3505 = vmatprep.subr.bf16.mxu0 %v3883_v47 }
 0x23f   : > { %3328 = vmatpush3.bf16.msra.mxu1 %v3891_v50 }
 0x240   : > { %2997 = vmatmul.mubr.msk.bf16.gmra.mrb[36].mxu0 %vm5211_vm9, %v5222_v52  ;;  %3329 = vmatprep.subr.bf16.mxu1 %v3893_v44  ;;  %vm5478_vm9 = vmpackc.low %vm4224_vm7, %vm3694_vm3 }
 0x241   : > { %2936 = vmatmul.mubr.msk.bf16.gmra.mrb[20].mxu1 %vm5418_vm15, %v5179_v45  ;;  %1938 = vmatprep.mubr.bf16.mxu0 %v5035_v31 }
 0x242   : > { %1616 = vmatprep.mubr.bf16.mxu1 %v5183_v33  ;;  %3506 = vmatpush3.bf16.msra.mxu0 %v3883_v47 }
 0x243   : > { %3507 = vmatprep.subr.bf16.mxu0 %v3886_v43  ;;  %3330 = vmatpush3.bf16.msra.mxu1 %v3894_v61 }
 0x244   : > { %3331 = vmatprep.subr.bf16.mxu1 %v3895_v24 }
 0x246   : > { %3508 = vmatpush3.bf16.msra.mxu0 %v3886_v43 }
 0x247   : > { %3509 = vmatprep.subr.bf16.mxu0 %v3889_v0  ;;  %3332 = vmatpush3.bf16.msra.mxu1 %v3896_v25 }
 0x248   : > { %3001 = vmatmul.mubr.msk.bf16.gmra.mrb[40].mxu0 %vm5338_vm1, %v5064_v36 }
 0x249   : > { %2940 = vmatmul.mubr.msk.bf16.gmra.mrb[24].mxu1 %vm5433_vm14, %v5264_v23  ;;  %1946 = vmatprep.mubr.bf16.mxu0 %v5078_v10 }
 0x24a   : > { %1624 = vmatprep.mubr.bf16.mxu1 %v5254_v60  ;;  %3510 = vmatpush3.bf16.msra.mxu0 %v3889_v0 }
 0x24b   : > { %3511 = vmatprep.subr.bf16.mxu0 %v3892_v38 }
 0x24e   : > { %3512 = vmatpush3.bf16.msra.mxu0 %v3892_v38 }
 0x24f   : > { %3513 = vmatprep.subr.bf16.mxu0 %v3897_v27 }
 0x250   : > { %3005 = vmatmul.mubr.msk.bf16.gmra.mrb[44].mxu0 %vm5381_vm13, %v5139_v37 }
 0x251   : > { %2944 = vmatmul.mubr.msk.bf16.gmra.mrb[28].mxu1 %vm5448_vm2, %v5286_v39  ;;  %1954 = vmatprep.mubr.bf16.mxu0 %v5143_v16 }
 0x252   : > { %1632 = vmatprep.mubr.bf16.mxu1 %v5274_v20  ;;  %3514 = vmatpush3.bf16.msra.mxu0 %v3897_v27 }
 0x253   : > { %3515 = vmatprep.subr.bf16.mxu0 %v3898_v9 }
 0x256   : > { %3516 = vmatpush3.bf16.msra.mxu0 %v3898_v9 }
 0x257   : > { %3533 = vmatprep.subr.bf16.mxu0 %v3899_v11 }
 0x258   : > { %3009 = vmatmul.mubr.msk.bf16.gmra.mrb[48].mxu0 %vm5418_vm15, %v5179_v45 }
 0x259   : > { %2948 = vmatmul.mubr.msk.bf16.gmra.mrb[32].mxu1 %vm5463_vm5, %v5292_v56  ;;  %1962 = vmatprep.mubr.bf16.mxu0 %v5183_v33 }
 0x25a   : > { %1640 = vmatprep.mubr.bf16.mxu1 %v5296_v19 }
 0x260   : > { %3013 = vmatmul.mubr.msk.bf16.gmra.mrb[52].mxu0 %vm5433_vm14, %v5264_v23 }
 0x261   : > { %2952 = vmatmul.mubr.msk.bf16.gmra.mrb[36].mxu1 %vm5478_vm9, %v5330_v59  ;;  %1970 = vmatprep.mubr.bf16.mxu0 %v5254_v60 }
 0x262   : > { %2333 = vmatprep.mubr.bf16.mxu1 %v5035_v31  ;;  %v6041_v31 = vld [vmem:[#allocation33_spill] sm:$0xff] }
 0x268   : > { %3017 = vmatmul.mubr.msk.bf16.gmra.mrb[56].mxu0 %vm5448_vm2, %v5286_v39 }
 0x269   : > { %1978 = vmatprep.mubr.bf16.mxu0 %v5274_v20  ;;  %3057 = vmatmul.mubr.msk.bf16.vlgmr.msra.gmra.mrb[40].mxu1 %vm5338_vm1, %v5064_v36  ;;  %vm6049_vm1 = vnez %v6014_v1 }
 0x26a   : > { %2341 = vmatprep.mubr.bf16.mxu1 %v5078_v10  ;;  %v3901_v10 = vld [vmem:[#allocation11 + $0x210] sm:$0xff]   ;;  %vm3082_vm7 = vmneg %vm6049_vm1 }
 0x270   : > { %3021 = vmatmul.mubr.msk.bf16.gmra.mrb[60].mxu0 %vm5463_vm5, %v5292_v56 }
 0x271   : > { %3517 = vmatprep.mubr.msk.bf16.mxu0 %vm4950_vm8, %v3024_v8  ;;  %3061 = vmatmul.mubr.msk.bf16.gmra.mrb[44].mxu1 %vm5381_vm13, %v5139_v37  ;;  %v6043_v37 = vld [vmem:[#allocation35_spill] sm:$0xff]  ;;  %vm3084_vm13 = vmpackc.low %vm3082_vm7, %vm3082_vm7 }
 0x272   : > { %2349 = vmatprep.mubr.bf16.mxu1 %v5143_v16  ;;  %v3902_v16 = vld [vmem:[#allocation11 + $0x218] sm:$0xff]  }
 0x273   : > { %v6047_v8 = vld [vmem:[#allocation39_spill] sm:$0xff] }
 0x278   : > { %3518 = vmatmul.mubr.msk.bf16.vlgmr.msra.gmra.mrb[16].mxu0 %vm4950_vm8, %v4960_v48  ;;  %v6045_v48 = vld [vmem:[#allocation37_spill] sm:$0xff] }
 0x279   : > { %3534 = vmatpush3.bf16.msra.mxu0 %v3899_v11  ;;  %3521 = vmatprep.mubr.msk.bf16.mxu0 %vm5005_vm11, %v6041_v31 }
 0x27a   : > { %3065 = vmatmul.mubr.msk.bf16.gmra.mrb[48].mxu1 %vm5418_vm15, %v5179_v45  ;;  %3535 = vmatprep.subr.bf16.mxu0 %v3900_v32  ;;  %v3903_v45 = vld [vmem:[#allocation11 + $0x220] sm:$0xff]  }
 0x27b   : > { %2357 = vmatprep.mubr.bf16.mxu1 %v5183_v33  ;;  %v3904_v33 = vld [vmem:[#allocation11 + $0x228] sm:$0xff]  }
 0x27d   : > { %3536 = vmatpush3.bf16.msra.mxu0 %v3900_v32 }
 0x27e   : > { %3537 = vmatprep.subr.bf16.mxu0 %v3901_v10 }
 0x280   : > { %3522 = vmatmul.mubr.msk.bf16.gmra.mrb[20].mxu0 %vm5022_vm12, %v6043_v37 }
 0x281   : > { %3538 = vmatpush3.bf16.msra.mxu0 %v3901_v10  ;;  %3525 = vmatprep.mubr.msk.bf16.mxu0 %vm5103_vm0, %v6045_v48 }
 0x282   : > { %3069 = vmatmul.mubr.msk.bf16.gmra.mrb[52].mxu1 %vm5433_vm14, %v5264_v23  ;;  %3539 = vmatprep.subr.bf16.mxu0 %v3902_v16  ;;  %v3905_v23 = vld [vmem:[#allocation11 + $0x230] sm:$0xff]  }
 0x283   : > { %2365 = vmatprep.mubr.bf16.mxu1 %v5254_v60  ;;  %v3906_v60 = vld [vmem:[#allocation11 + $0x238] sm:$0xff]  }
 0x285   : > { %3540 = vmatpush3.bf16.msra.mxu0 %v3902_v16 }
 0x286   : > { %3541 = vmatprep.subr.bf16.mxu0 %v3903_v45 }
 0x288   : > { %3526 = vmatmul.mubr.msk.bf16.gmra.mrb[24].mxu0 %vm5120_vm4, %v6047_v8 }
 0x289   : > { %3542 = vmatpush3.bf16.msra.mxu0 %v3903_v45  ;;  %3529 = vmatprep.mubr.msk.bf16.mxu0 %vm5192_vm6, %v5206_v62 }
 0x28a   : > { %3073 = vmatmul.mubr.msk.bf16.gmra.mrb[56].mxu1 %vm5448_vm2, %v5286_v39  ;;  %3543 = vmatprep.subr.bf16.mxu0 %v3904_v33 }
 0x28b   : > { %2373 = vmatprep.mubr.bf16.mxu1 %v5274_v20 }
 0x28d   : > { %3544 = vmatpush3.bf16.msra.mxu0 %v3904_v33 }
 0x28e   : > { %3545 = vmatprep.subr.bf16.mxu0 %v3905_v23 }
 0x290   : > { %3530 = vmatmul.mubr.msk.bf16.gmra.mrb[28].mxu0 %vm5231_vm10, %v5244_v55 }
 0x291   : > { %3546 = vmatpush3.bf16.msra.mxu0 %v3905_v23  ;;  %3549 = vmatprep.mubr.msk.bf16.mxu0 %vm5005_vm11, %v6041_v31  ;;  %vm6050_vm11 = vnez %v5993_v6 }
 0x292   : > { %3077 = vmatmul.mubr.msk.bf16.gmra.mrb[60].mxu1 %vm5463_vm5, %v5292_v56  ;;  %3547 = vmatprep.subr.bf16.mxu0 %v3906_v60 }
 0x293   : > { %2381 = vmatprep.mubr.bf16.mxu1 %v5296_v19 }
 0x295   : > { %3548 = vmatpush3.bf16.msra.mxu0 %v3906_v60 }
 0x298   : > { %3550 = vmatmul.mubr.msk.bf16.vlgmr.msra.gmra.mrb[16].mxu0 %vm5022_vm12, %v6043_v37  ;;  %vm6051_vm12 = vnez %v6010_v4 }
 0x299   : > { %3553 = vmatprep.mubr.msk.bf16.mxu0 %vm5103_vm0, %v6045_v48 }
 0x29a   : > { %3081 = vmatmul.mubr.msk.bf16.gmra.mrb[64].mxu1 %vm5478_vm9, %v5330_v59 }
 0x29b   : > { %3086 = vmatprep.mubr.msk.bf16.mxu1 %vm3084_vm13, %v3085_v22 }
 0x2a0   : > { %3554 = vmatmul.mubr.msk.bf16.gmra.mrb[20].mxu0 %vm5120_vm4, %v6047_v8 }
 0x2a1   : > { %3557 = vmatprep.mubr.msk.bf16.mxu0 %vm5192_vm6, %v5206_v62 }
 0x2a2   : > { %3090 = vmatmul.mubr.msk.bf16.gmra.mrb[68].mxu1 %vm6050_vm11, %v3089_v7 }
 0x2a8   : > { %3558 = vmatmul.mubr.msk.bf16.gmra.mrb[24].mxu0 %vm5231_vm10, %v5244_v55 }
 0x2a9   : > { %3561 = vmatprep.mubr.msk.bf16.mxu0 %vm6051_vm12, %v5235_v15 }
 0x2b0   : > { %3562 = vmatmul.mubr.msk.bf16.gmra.mrb[28].mxu0 %vm4950_vm8, %v3121_v34 }
 0x2fa   : > { %v3173_v41 = vpop.f32.mrb[8].mxu1 }
 0x2fb   : > { %v3174_v62 = vpop.f32.mrb[9].mxu1 }
 0x2fc   : > { %v3175_v20 = vadd.f32 %v3174_v62, %v3173_v41  ;;  %v3176_v39 = vpop.f32.mrb[10].mxu1 }
 0x2fd   : > { %v3177_v6 = vpop.f32.mrb[11].mxu1 }
 0x2fe   : > { %v3178_v56 = vadd.f32 %v3177_v6, %v3176_v39 }
 0x304   : > { %v3179_v19 = vpop.f32.mrb[12].mxu1 }
 0x305   : > { %v3180_v59 = vpop.f32.mrb[13].mxu1 }
 0x306   : > { %v3181_v49 = vadd.f32 %v3180_v59, %v3179_v19  ;;  %v3182_v55 = vpop.f32.mrb[14].mxu1 }
 0x307   : > { %v3183_v1 = vpop.f32.mrb[15].mxu1 }
 0x308   : > { %v3184_v57 = vadd.f32 %v3183_v1, %v3182_v55 }
 0x30b   : > { %v3253_v4 = vpop.f32.mrb[32].mxu0 }
 0x30c   : > { %v3185_v15 = vpop.f32.mrb[16].mxu1  ;;  %v3254_v51 = vpop.f32.mrb[33].mxu0 }
 0x30d   : > { %v3255_v22 = vadd.f32 %v3254_v51, %v3253_v4  ;;  %v3186_v21 = vpop.f32.mrb[17].mxu1  ;;  %v3256_v18 = vpop.f32.mrb[34].mxu0 }
 0x30e   : > { %v3187_v46 = vadd.f32 %v3186_v21, %v3185_v15  ;;  %v3188_v12 = vpop.f32.mrb[18].mxu1  ;;  %v3257_v17 = vpop.f32.mrb[35].mxu0 }
 0x30f   : > { %v5586_v42 = vadd.f32 %v3255_v22, %v3175_v20  ;;  %v3258_v29 = vadd.f32 %v3257_v17, %v3256_v18  ;;  %v3189_v7 = vpop.f32.mrb[19].mxu1 }
 0x310   : > { %v3190_v34 = vadd.f32 %v3189_v7, %v3188_v12 }
 0x311   : > { %v5588_v2 = vadd.f32 %v3258_v29, %v3178_v56 }
 0x313   : > { %v3259_v54 = vpop.f32.mrb[36].mxu0 }
 0x314   : > { %v3191_v47 = vpop.f32.mrb[20].mxu1  ;;  %v3260_v63 = vpop.f32.mrb[37].mxu0 }
 0x315   : > { %v3261_v50 = vadd.f32 %v3260_v63, %v3259_v54  ;;  %v3192_v44 = vpop.f32.mrb[21].mxu1  ;;  %v3262_v53 = vpop.f32.mrb[38].mxu0 }
 0x316   : > { %v3193_v43 = vadd.f32 %v3192_v44, %v3191_v47  ;;  %v3194_v61 = vpop.f32.mrb[22].mxu1  ;;  %v3263_v24 = vpop.f32.mrb[39].mxu0 }
 0x317   : > { %v5590_v40 = vadd.f32 %v3261_v50, %v3181_v49  ;;  %v3264_v0 = vadd.f32 %v3263_v24, %v3262_v53  ;;  %v3195_v25 = vpop.f32.mrb[23].mxu1 }
 0x318   : > { %v3196_v52 = vadd.f32 %v3195_v25, %v3194_v61 }
 0x319   : > { %v5592_v38 = vadd.f32 %v3264_v0, %v3184_v57 }
 0x31b   : > { %v3265_v26 = vpop.f32.mrb[40].mxu0 }
 0x31c   : > { %v3197_v27 = vpop.f32.mrb[24].mxu1  ;;  %v3266_v58 = vpop.f32.mrb[41].mxu0 }
 0x31d   : > { %v3267_v9 = vadd.f32 %v3266_v58, %v3265_v26  ;;  %v3198_v28 = vpop.f32.mrb[25].mxu1  ;;  %v3268_v11 = vpop.f32.mrb[42].mxu0 }
 0x31e   : > { %v3199_v3 = vadd.f32 %v3198_v28, %v3197_v27  ;;  %v3200_v30 = vpop.f32.mrb[26].mxu1  ;;  %v3269_v14 = vpop.f32.mrb[43].mxu0 }
 0x31f   : > { %v5594_v32 = vadd.f32 %v3267_v9, %v3187_v46  ;;  %v3270_v31 = vadd.f32 %v3269_v14, %v3268_v11  ;;  %v3201_v36 = vpop.f32.mrb[27].mxu1 }
 0x320   : > { %v3202_v10 = vadd.f32 %v3201_v36, %v3200_v30 }
 0x321   : > { %v5596_v16 = vadd.f32 %v3270_v31, %v3190_v34 }
 0x323   : > { %v3271_v37 = vpop.f32.mrb[44].mxu0 }
 0x324   : > { %v3203_v35 = vpop.f32.mrb[28].mxu1  ;;  %v3272_v48 = vpop.f32.mrb[45].mxu0 }
 0x325   : > { %v3273_v5 = vadd.f32 %v3272_v48, %v3271_v37  ;;  %v3204_v45 = vpop.f32.mrb[29].mxu1  ;;  %v3274_v33 = vpop.f32.mrb[46].mxu0 }
 0x326   : > { %v3205_v8 = vadd.f32 %v3204_v45, %v3203_v35  ;;  %v3206_v13 = vpop.f32.mrb[30].mxu1  ;;  %v3275_v23 = vpop.f32.mrb[47].mxu0 }
 0x327   : > { %v5598_v60 = vadd.f32 %v3273_v5, %v3193_v43  ;;  %v3276_v41 = vadd.f32 %v3275_v23, %v3274_v33  ;;  %v3207_v62 = vpop.f32.mrb[31].mxu1 }
 0x328   : > { %v3208_v20 = vadd.f32 %v3207_v62, %v3206_v13 }
 0x329   : > { %v5600_v39 = vadd.f32 %v3276_v41, %v3196_v52 }
 0x32b   : > { %v3277_v6 = vpop.f32.mrb[48].mxu0 }
 0x32c   : > { %v3209_v56 = vpop.f32.mrb[32].mxu1  ;;  %v3278_v19 = vpop.f32.mrb[49].mxu0 }
 0x32d   : > { %v3279_v59 = vadd.f32 %v3278_v19, %v3277_v6  ;;  %v3210_v49 = vpop.f32.mrb[33].mxu1  ;;  %v3280_v55 = vpop.f32.mrb[50].mxu0 }
 0x32e   : > { %v3211_v1 = vadd.f32 %v3210_v49, %v3209_v56  ;;  %v3212_v57 = vpop.f32.mrb[34].mxu1  ;;  %v3281_v4 = vpop.f32.mrb[51].mxu0 }
 0x32f   : > { %v5602_v15 = vadd.f32 %v3279_v59, %v3199_v3  ;;  %v3282_v51 = vadd.f32 %v3281_v4, %v3280_v55  ;;  %v3213_v22 = vpop.f32.mrb[35].mxu1 }
 0x330   : > { %v3214_v21 = vadd.f32 %v3213_v22, %v3212_v57 }
 0x331   : > { %v5604_v18 = vadd.f32 %v3282_v51, %v3202_v10 }
 0x333   : > { %v3283_v46 = vpop.f32.mrb[52].mxu0 }
 0x334   : > { %v3215_v12 = vpop.f32.mrb[36].mxu1  ;;  %v3284_v17 = vpop.f32.mrb[53].mxu0 }
 0x335   : > { %v3285_v29 = vadd.f32 %v3284_v17, %v3283_v46  ;;  %v3216_v7 = vpop.f32.mrb[37].mxu1  ;;  %v3286_v34 = vpop.f32.mrb[54].mxu0 }
 0x336   : > { %v3217_v54 = vadd.f32 %v3216_v7, %v3215_v12  ;;  %v3218_v47 = vpop.f32.mrb[38].mxu1  ;;  %v3287_v63 = vpop.f32.mrb[55].mxu0 }
 0x337   : > { %v5606_v50 = vadd.f32 %v3285_v29, %v3205_v8  ;;  %v3288_v44 = vadd.f32 %v3287_v63, %v3286_v34  ;;  %v3219_v53 = vpop.f32.mrb[39].mxu1 }
 0x338   : > { %v3220_v43 = vadd.f32 %v3219_v53, %v3218_v47 }
 0x339   : > { %v5608_v61 = vadd.f32 %v3288_v44, %v3208_v20 }
 0x33b   : > { %v3289_v24 = vpop.f32.mrb[56].mxu0 }
 0x33c   : > { %v3290_v0 = vpop.f32.mrb[57].mxu0  ;;  %v3333_v25 = vpop.f32.mrb[40].mxu1 }
 0x33d   : > { %v3291_v52 = vadd.f32 %v3290_v0, %v3289_v24  ;;  %v3292_v26 = vpop.f32.mrb[58].mxu0  ;;  %v3334_v27 = vpop.f32.mrb[41].mxu1 }
 0x33e   : > { %v3335_v58 = vadd.f32 %v3334_v27, %v3333_v25  ;;  %v3293_v9 = vpop.f32.mrb[59].mxu0  ;;  %v3336_v28 = vpop.f32.mrb[42].mxu1 }
 0x33f   : > { %v5610_v11 = vadd.f32 %v3291_v52, %v3211_v1  ;;  %v3294_v3 = vadd.f32 %v3293_v9, %v3292_v26  ;;  %v3337_v30 = vpop.f32.mrb[43].mxu1  ;;  %v5646_v26 = vld [vmem:[%s6052_s13] ss:$0 sm:$0xff] }
 0x340   : > { %v3338_v14 = vadd.f32 %v3337_v30, %v3336_v28  ;;  %v3569_v31 = vadd.f32 %v5586_v42, %v3335_v58 }
 0x341   : > { %v5613_v36 = vadd.f32 %v3294_v3, %v3214_v21 }
 0x342   : > { %v5616_v10 = vadd.f32 %v5588_v2, %v3338_v14 }
 0x343   : > { %v3295_v37 = vpop.f32.mrb[60].mxu0 }
 0x344   : > { %v3296_v35 = vpop.f32.mrb[61].mxu0  ;;  %v3339_v48 = vpop.f32.mrb[44].mxu1 }
 0x345   : > { %v3297_v5 = vadd.f32 %v3296_v35, %v3295_v37  ;;  %v3298_v45 = vpop.f32.mrb[62].mxu0  ;;  %v3340_v33 = vpop.f32.mrb[45].mxu1 }
 0x346   : > { %v3341_v8 = vadd.f32 %v3340_v33, %v3339_v48  ;;  %v3299_v13 = vpop.f32.mrb[63].mxu0  ;;  %v3342_v23 = vpop.f32.mrb[46].mxu1 }
 0x347   : > { %v5618_v41 = vadd.f32 %v3297_v5, %v3217_v54  ;;  %v3300_v62 = vadd.f32 %v3299_v13, %v3298_v45  ;;  %v3343_v20 = vpop.f32.mrb[47].mxu1 }
 0x348   : > { %v3344_v6 = vadd.f32 %v3343_v20, %v3342_v23  ;;  %v3566_v42 = vadd.f32 %v5590_v40, %v3341_v8 }
 0x349   : > { %v5621_v56 = vadd.f32 %v3300_v62, %v3220_v43 }
 0x34a   : > { %v3572_v2 = vadd.f32 %v5592_v38, %v3344_v6  ;;  %v2566_v6 = vld [vmem:[%s4676_s3] sm:$0xff] }
 0x34d   : > { %v3345_v19 = vpop.f32.mrb[48].mxu1 }
 0x34e   : > { %v3346_v59 = vpop.f32.mrb[49].mxu1 }
 0x34f   : > { %v3347_v49 = vadd.f32 %v3346_v59, %v3345_v19  ;;  %v3348_v55 = vpop.f32.mrb[50].mxu1  ;;  %v2569_v19 = vld [vmem:[%s4676_s3 + $0x18] sm:$0xff] }
 0x350   : > { %v3349_v1 = vpop.f32.mrb[51].mxu1 }
 0x351   : > { %v3350_v57 = vadd.f32 %v3349_v1, %v3348_v55  ;;  %v5625_v4 = vadd.f32 %v5594_v32, %v3347_v49 }
 0x353   : > { %v5628_v51 = vadd.f32 %v5596_v16, %v3350_v57  ;;  %v2567_v57 = vld [vmem:[%s4676_s3 + $0x8] sm:$0xff] }
 0x355   : > { %v3351_v22 = vpop.f32.mrb[52].mxu1 }
 0x356   : > { %v3352_v21 = vpop.f32.mrb[53].mxu1 }
 0x357   : > { %v3353_v46 = vadd.f32 %v3352_v21, %v3351_v22  ;;  %v3354_v40 = vpop.f32.mrb[54].mxu1 }
 0x358   : > { %v3355_v12 = vpop.f32.mrb[55].mxu1 }
 0x359   : > { %v3356_v17 = vadd.f32 %v3355_v12, %v3354_v40  ;;  %v3578_v38 = vadd.f32 %v5598_v60, %v3353_v46 }
 0x35b   : > { %v5632_v29 = vadd.f32 %v5600_v39, %v3356_v17 }
 0x35d   : > { %v3357_v7 = vpop.f32.mrb[56].mxu1 }
 0x35e   : > { %v3358_v34 = vpop.f32.mrb[57].mxu1 }
 0x35f   : > { %v3359_v54 = vadd.f32 %v3358_v34, %v3357_v7  ;;  %v3360_v47 = vpop.f32.mrb[58].mxu1 }
 0x360   : > { %v3361_v32 = vpop.f32.mrb[59].mxu1 }
 0x361   : > { %v3362_v63 = vadd.f32 %v3361_v32, %v3360_v47  ;;  %v5635_v16 = vadd.f32 %v5602_v15, %v3359_v54 }
 0x363   : > { %v5638_v44 = vadd.f32 %v5604_v18, %v3362_v63 }
 0x365   : > { %v3363_v53 = vpop.f32.mrb[60].mxu1 }
 0x366   : > { %v3364_v43 = vpop.f32.mrb[61].mxu1 }
 0x367   : > { %v3365_v24 = vadd.f32 %v3364_v43, %v3363_v53  ;;  %v3366_v0 = vpop.f32.mrb[62].mxu1 }
 0x368   : > { %v3367_v60 = vpop.f32.mrb[63].mxu1 }
 0x369   : > { %v3368_v25 = vadd.f32 %v3367_v60, %v3366_v0  ;;  %v5641_v39 = vadd.f32 %v5606_v50, %v3365_v24  ;;  %v2572_v60 = vld [vmem:[%s4676_s3 + $0x30] sm:$0xff] }
 0x36b   : > { %v3551_v52 = vpop.f32.mrb[16].mxu0  ;;  %v5649_v15 = vadd.f32 %v5608_v61, %v3368_v25 }
 0x36c   : > { %v3567_v18 = vadd.f32 %v3566_v42, %v3551_v52  ;;  %v2432_v27 = vpop.f32.mrb[17].mxu0 }
 0x36d   : > { %v3369_v58 = vpop.f32.mrb[64].mxu1  ;;  %v3570_v9 = vadd.f32 %v3569_v31, %v2432_v27  ;;  %v3552_v28 = vpop.f32.mrb[18].mxu0  ;;  %v2568_v31 = vld [vmem:[%s4676_s3 + $0x10] sm:$0xff] }
 0x36e   : > { %v2520_v3 = vadd.f32 %v3567_v18, %v5646_v26  ;;  %v3370_v30 = vpop.f32.mrb[65].mxu1  ;;  %v3573_v50 = vadd.f32 %v3572_v2, %v3552_v28  ;;  %v2435_v14 = vpop.f32.mrb[19].mxu0 }
 0x36f   : > { %v2518_v37 = vadd.f32 %v3570_v9, %v5646_v26  ;;  %v3371_v35 = vadd.f32 %v3370_v30, %v3369_v58  ;;  %v3372_v48 = vpop.f32.mrb[66].mxu1  ;;  %v3576_v61 = vadd.f32 %v5616_v10, %v2435_v14  ;;  %v2570_v58 = vld [vmem:[%s4676_s3 + $0x20] sm:$0xff] }
 0x370   : > { %v2536_v5 = vmul.f32 0.1, %v2520_v3  ;;  %v2521_v45 = vadd.f32 %v3573_v50, %v5646_v26  ;;  %v3373_v33 = vpop.f32.mrb[67].mxu1 }
 0x371   : > { %v2534_v8 = vmul.f32 0.1, %v2518_v37  ;;  %v2519_v13 = vadd.f32 %v3576_v61, %v5646_v26  ;;  %v3374_v23 = vadd.f32 %v3373_v33, %v3372_v48  ;;  %v5658_v62 = vadd.f32 %v5610_v11, %v3371_v35  ;;  %v2571_v35 = vld [vmem:[%s4676_s3 + $0x28] sm:$0xff] }
 0x372   : > { %v2552_v20 = vmax.f32 %v2520_v3, %v2536_v5  ;;  %v2537_v42 = vmul.f32 0.1, %v2521_v45 }
 0x373   : > { %v2550_v2 = vmax.f32 %v2518_v37, %v2534_v8  ;;  %v2535_v10 = vmul.f32 0.1, %v2519_v13  ;;  %v3555_v59 = vpop.f32.mrb[20].mxu0  ;;  %v5663_v49 = vadd.f32 %v5613_v36, %v3374_v23 }
 0x374   : > { %v2584_v55 = vadd.f32 %v2568_v31, %v2552_v20  ;;  %v2553_v1 = vmax.f32 %v2521_v45, %v2537_v42  ;;  %v3579_v22 = vadd.f32 %v3578_v38, %v3555_v59  ;;  %v2448_v21 = vpop.f32.mrb[21].mxu0  ;;  %v2576_v42 = vld [vmem:[%s4676_s3 + $0x50] sm:$0xff] }
 0x375   : > { %v2582_v46 = vadd.f32 %v2566_v6, %v2550_v2  ;;  %v2551_v40 = vmax.f32 %v2519_v13, %v2535_v10  ;;  %v3375_v11 = vpop.f32.mrb[68].mxu1  ;;  %v3582_v12 = vadd.f32 %v5625_v4, %v2448_v21  ;;  %v3556_v17 = vpop.f32.mrb[22].mxu0 }
 0x376   : > { %2600 = vst [vmem:[%s5669_s24 + $0x10] sm:$0xff] %v2584_v55  ;;  %v2585_v36 = vadd.f32 %v2569_v19, %v2553_v1  ;;  %v2524_v7 = vadd.f32 %v3579_v22, %v5646_v26  ;;  %v3376_v38 = vpop.f32.mrb[69].mxu1  ;;  %v3585_v34 = vadd.f32 %v5632_v29, %v3556_v17  ;;  %v2451_v54 = vpop.f32.mrb[23].mxu0  ;;  %v2577_v1 = vld [vmem:[%s4676_s3 + $0x58] sm:$0xff] }
 0x377   : > { %2598 = vst [vmem:[%s5669_s24] sm:$0xff] %v2582_v46  ;;  %v2583_v47 = vadd.f32 %v2567_v57, %v2551_v40  ;;  %v2522_v4 = vadd.f32 %v3582_v12, %v5646_v26  ;;  %v3377_v32 = vadd.f32 %v3376_v38, %v3375_v11  ;;  %v3378_v63 = vpop.f32.mrb[70].mxu1  ;;  %v3588_v53 = vadd.f32 %v5628_v51, %v2451_v54  ;;  %v2573_v51 = vld [vmem:[%s4676_s3 + $0x38] sm:$0xff]  ;;  %v2575_v46 = vld [vmem:[%s4676_s3 + $0x48] sm:$0xff] }
 0x378   : > { %2601 = vst [vmem:[%s5669_s24 + $0x18] sm:$0xff] %v2585_v36  ;;  %v2540_v43 = vmul.f32 0.1, %v2524_v7  ;;  %v2525_v24 = vadd.f32 %v3585_v34, %v5646_v26  ;;  %v3379_v0 = vpop.f32.mrb[71].mxu1 }
 0x379   : > { %2599 = vst [vmem:[%s5669_s24 + $0x8] sm:$0xff] %v2583_v47  ;;  %v2538_v29 = vmul.f32 0.1, %v2522_v4  ;;  %v2523_v25 = vadd.f32 %v3588_v53, %v5646_v26  ;;  %v3380_v52 = vadd.f32 %v3379_v0, %v3378_v63  ;;  %v3602_v18 = vadd.f32 %v5618_v41, %v3377_v32 }
 0x37a   : > { %v2556_v27 = vmax.f32 %v2524_v7, %v2540_v43  ;;  %v2541_v9 = vmul.f32 0.1, %v2525_v24  ;;  %v2580_v43 = vld [vmem:[%s4676_s3 + $0x70] sm:$0xff] }
 0x37b   : > { %v2554_v28 = vmax.f32 %v2522_v4, %v2538_v29  ;;  %v2539_v3 = vmul.f32 0.1, %v2523_v25  ;;  %v3559_v30 = vpop.f32.mrb[24].mxu0  ;;  %v3608_v50 = vadd.f32 %v5621_v56, %v3380_v52  ;;  %v2578_v29 = vld [vmem:[%s4676_s3 + $0x60] sm:$0xff] }
 0x37c   : > { %v2588_v14 = vadd.f32 %v2572_v60, %v2556_v27  ;;  %v2557_v37 = vmax.f32 %v2525_v24, %v2541_v9  ;;  %v3591_v48 = vadd.f32 %v5641_v39, %v3559_v30  ;;  %v2464_v61 = vpop.f32.mrb[25].mxu0  ;;  %v2579_v9 = vld [vmem:[%s4676_s3 + $0x68] sm:$0xff] }
 0x37d   : > { %v2586_v5 = vadd.f32 %v2570_v58, %v2554_v28  ;;  %v2555_v41 = vmax.f32 %v2523_v25, %v2539_v3  ;;  %v3594_v45 = vadd.f32 %v5635_v16, %v2464_v61  ;;  %v3560_v33 = vpop.f32.mrb[26].mxu0 }
 0x37e   : > { %2604 = vst [vmem:[%s5669_s24 + $0x30] sm:$0xff] %v2588_v14  ;;  %v2589_v31 = vadd.f32 %v2573_v51, %v2557_v37  ;;  %v2528_v8 = vadd.f32 %v3591_v48, %v5646_v26  ;;  %v3597_v56 = vadd.f32 %v5649_v15, %v3560_v33  ;;  %v2467_v13 = vpop.f32.mrb[27].mxu0  ;;  %v2574_v15 = vld [vmem:[%s4676_s3 + $0x40] sm:$0xff] }
 0x37f   : > { %2602 = vst [vmem:[%s5669_s24 + $0x20] sm:$0xff] %v2586_v5  ;;  %v2587_v23 = vadd.f32 %v2571_v35, %v2555_v41  ;;  %v2526_v39 = vadd.f32 %v3594_v45, %v5646_v26  ;;  %v3600_v20 = vadd.f32 %v5638_v44, %v2467_v13 }
 0x380   : > { %2605 = vst [vmem:[%s5669_s24 + $0x38] sm:$0xff] %v2589_v31  ;;  %v2544_v6 = vmul.f32 0.1, %v2528_v8  ;;  %v2529_v16 = vadd.f32 %v3597_v56, %v5646_v26 }
 0x381   : > { %2603 = vst [vmem:[%s5669_s24 + $0x28] sm:$0xff] %v2587_v23  ;;  %v2542_v2 = vmul.f32 0.1, %v2526_v39  ;;  %v2527_v19 = vadd.f32 %v3600_v20, %v5646_v26 }
 0x382   : > { %v2560_v10 = vmax.f32 %v2528_v8, %v2544_v6  ;;  %v2545_v59 = vmul.f32 0.1, %v2529_v16 }
 0x383   : > { %v2558_v55 = vmax.f32 %v2526_v39, %v2542_v2  ;;  %v2543_v57 = vmul.f32 0.1, %v2527_v19  ;;  %v3563_v22 = vpop.f32.mrb[28].mxu0 }
 0x384   : > { %v2592_v44 = vadd.f32 %v2576_v42, %v2560_v10  ;;  %v2561_v21 = vmax.f32 %v2529_v16, %v2545_v59  ;;  %v3603_v40 = vadd.f32 %v3602_v18, %v3563_v22  ;;  %v2480_v11 = vpop.f32.mrb[29].mxu0  ;;  %v2581_v18 = vld [vmem:[%s4676_s3 + $0x78] sm:$0xff]  ;;  %s2615_s3 = scalar_lea.sflag [#allocation5], %s4670_s10 }
 0x385   : > { %v2590_v12 = vadd.f32 %v2574_v15, %v2558_v55  ;;  %v2559_v17 = vmax.f32 %v2527_v19, %v2543_v57  ;;  %v3606_v36 = vadd.f32 %v5658_v62, %v2480_v11  ;;  %v3564_v7 = vpop.f32.mrb[30].mxu0 }
 0x386   : > { %2608 = vst [vmem:[%s5669_s24 + $0x50] sm:$0xff] %v2592_v44  ;;  %v2593_v38 = vadd.f32 %v2577_v1, %v2561_v21  ;;  %v2532_v34 = vadd.f32 %v3603_v40, %v5646_v26  ;;  %v3609_v54 = vadd.f32 %v3608_v50, %v3564_v7  ;;  %v2483_v47 = vpop.f32.mrb[31].mxu0 }
 0x387   : > { %2606 = vst [vmem:[%s5669_s24 + $0x40] sm:$0xff] %v2590_v12  ;;  %v2591_v4 = vadd.f32 %v2575_v46, %v2559_v17  ;;  %v2530_v32 = vadd.f32 %v3606_v36, %v5646_v26  ;;  %v3612_v62 = vadd.f32 %v5663_v49, %v2483_v47 }
 0x388   : > { %2609 = vst [vmem:[%s5669_s24 + $0x58] sm:$0xff] %v2593_v38  ;;  %v2548_v63 = vmul.f32 0.1, %v2532_v34  ;;  %v2533_v53 = vadd.f32 %v3609_v54, %v5646_v26 }
 0x389   : > { %2607 = vst [vmem:[%s5669_s24 + $0x48] sm:$0xff] %v2591_v4  ;;  %v2546_v24 = vmul.f32 0.1, %v2530_v32  ;;  %v2531_v0 = vadd.f32 %v3612_v62, %v5646_v26 }
 0x38a   : > { %v2564_v60 = vmax.f32 %v2532_v34, %v2548_v63  ;;  %v2549_v25 = vmul.f32 0.1, %v2533_v53 }
 0x38b   : > { %v2562_v52 = vmax.f32 %v2530_v32, %v2546_v24  ;;  %v2547_v49 = vmul.f32 0.1, %v2531_v0 }
 0x38c   : > { %v2596_v27 = vadd.f32 %v2580_v43, %v2564_v60  ;;  %v2565_v58 = vmax.f32 %v2533_v53, %v2549_v25 }
 0x38d   : > { %v2594_v28 = vadd.f32 %v2578_v29, %v2562_v52  ;;  %v2563_v51 = vmax.f32 %v2531_v0, %v2547_v49 }
 0x38e   : > { %2612 = vst [vmem:[%s5669_s24 + $0x70] sm:$0xff] %v2596_v27  ;;  %v2597_v26 = vadd.f32 %v2581_v18, %v2565_v58 }
 0x38f   : > { %2610 = vst [vmem:[%s5669_s24 + $0x60] sm:$0xff] %v2594_v28  ;;  %v2595_v3 = vadd.f32 %v2579_v9, %v2563_v51 }
 0x390   : > { %2613 = vst [vmem:[%s5669_s24 + $0x78] sm:$0xff] %v2597_v26 }
 0x391   : > { %2611 = vst [vmem:[%s5669_s24 + $0x68] sm:$0xff] %v2595_v3 }
 0x392   : > { %4066 = shalt.err (!%p4063_p9)
}
 0x393   : > { %s4067_s25 = scalar_lea.hbm %s5727_s15, 2048  ;;  %s4071_s13 = scalar_lea.hbm %s6054_s16, 8192 }
 0x394   : > { %p4068_p11 = scmp.ne.s32.totalorder %s5727_s15, %s4067_s25  ;;  %p4072_p4 = scmp.lt.u32.totalorder %s5727_s15, %s6054_s16 }
 0x395   : > { %p4073_p10 = scmp.lt.u32.totalorder %s4071_s13, %s4067_s25  ;;  %p4075_p8 = scmp.lt.u32.totalorder %s4067_s25, %s5727_s15 }
 0x396   : > { %p4069_p3 = pnand %p4068_p11, %p6055_p0 }
 0x397   : > { %p4074_p12 = por %p4073_p10, %p4072_p4 }
 0x398   : > { %p4070_p7 = pneg %p4069_p3 }
 0x399   : > { %p4076_p13 = por %p4075_p8, %p4074_p12 }
 0x39b   : > { %p4077_p1 = pnand %p4076_p13, %p4070_p7 }
 0x39d   : > { %4080 = shalt.err (!%p4077_p1)
}
 0x39e   : > { %s4226_s18 = smov 128   ;;  %s4227_s17 = smov 8  }
 0x39f   : > { %3659 = dma.vmem_to_hbm [thread:$0]  (%p6055_p0), %s5721_s19, 2048, %s5727_s15, %s2615_s3, %s4226_s18, %s4226_s18, %s4227_s17  }
 0x3a0 PF: > { %p3703_p2 = scmp.ge.s32.totalorder %s4211_s14, 2  ;;  %s2646_s1 = sand.u32 1, %s4183_s30  }
 0x3a1   : > { %p6056_p5 = scmp.ne.s32.totalorder %s5911_s26, 0  ;;  %s2647_s0 = scalar_lea.sflag [#allocation5], %s2646_s1 }
 0x3a3   : > { %p3679_p6 = pnand %p3703_p2, %p6056_p5 }
 0x3a5   : > { %4154 = dma.done.wait (!%p3679_p6), %s2647_s0, 2048  }
 0x3a6   : > { %4156 = vsyncadd (!%p3679_p6), %s2647_s0, 4294965248  ;;  %s27_s14 = sadd.s32 1, %s4211_s14   ;;  %s6058_s24 = sld [smem:[#allocation19_spill]] }
 0x3a7   : > { %p5760_p9 = scmp.ge.s32.totalorder %s27_s14, 6   ;;  %s6059_s25 = sld [smem:[#allocation20_spill]] }
 0x3a8   : > { %s6060_s2 = sld [smem:[#allocation21_spill]]  ;;  %s6061_s10 = smov %s4428_s27 }
 0x3a9   : > { %s6062_s19 = sld [smem:[#allocation31_spill]]  ;;  %s6063_s15 = sld [smem:[#allocation24_spill]] }
 0x3aa   : > { %s6064_s11 = sld [smem:[#allocation25_spill]]  ;;  %s6065_s12 = sld [smem:[#allocation27_spill]] }
 0x3ab   : > { %s6066_s13 = sld [smem:[#allocation28_spill]]  ;;  %s6067_s26 = smov %s6090_s6 }
 0x3ac   : > { %s6069_s28 = smov %s4179_s29  ;;  %s6070_s29 = smov %s6061_s10 }
 0x3ad   : > { %s6071_s30 = smov %s4187_s8  ;;  %s6072_s8 = smov %s4191_s9 }
 0x3ae   : > { %s6068_s27 = smov %s6060_s2  ;;  %26 = sbr.rel (!%p5760_p9) target bundleno = 22 (0x16), region = 127 }
 0x3af   : > { %s6073_s9 = smov %s6062_s19  ;;  %s6074_s10 = smov %s6063_s15 }
 0x3b5   :  { %2652 = vsyncpa [#allocation4], 1 }
 0x3b6   :  { %2654 = vsyncpa [#allocation4 + $0x1], 1 }
 0x3b7   :  { %2655 = vsyncpa [#allocation7], 1 }
 0x3b8   :  { %2657 = vsyncpa [#allocation7 + $0x1], 1 }
 0x3b9   :  { %2658 = vsyncpa [#allocation10], 1 }
 0x3ba   :  { %2659 = vsyncpa [#allocation5], 1 }
 0x3bb   :  { %2661 = vsyncpa [#allocation5 + $0x1], 1 }

</bundles_post_ra>
